<compile_context>
chip_gen: v5e
topology: v5e:2x2
jax: 0.10.0
libtpu: 0.0.40
codegen_flags: <defaults>
</compile_context>

<pallas_src>
import functools

import jax
import jax.numpy as jnp
from jax.experimental import pallas as pl
from jax.experimental.pallas import tpu as pltpu


# ----------------------------------------------------------------------------
# Model configuration (canonical small TS-TCC encoder)
# ----------------------------------------------------------------------------
C_IN, C1, C2, C3 = 4, 8, 16, 32
KSIZE = 7
CONV_PAD = KSIZE // 2        # "same" conv for odd K (parameterized explicitly)
HIDDEN, PROJ = 32, 16
CP = 128                     # lane-padded channel width (multiple of 128)
TEMPERATURE = 0.2


# ----------------------------------------------------------------------------
# Pallas kernels
# ----------------------------------------------------------------------------
def _encoder_kernel(x_ref, w1_ref, b1_ref, w2_ref, b2_ref, w3_ref, b3_ref,
                    ctx_ref, *, conv_pad):
    """Fused 3-block conv encoder + temporal sum for ONE sample (grid over batch).

    x_ref:  (1, L, CP)   bf16, channels-last, channel-padded to CP lanes
    w_ref:  (K, CP, CP)  bf16, BN-folded, zero-padded
    b_ref:  (1, CP)      f32, BN-folded, zero-padded
    ctx_ref:(1, 1, CP)   f32, temporal SUM of final features (1/T folded into
                         the projection weights downstream).
    """

    def conv_bn_relu_pool(a, w_ref, b_ref):
        l_in, cp = a.shape
        k = w_ref.shape[0]
        a = a.astype(jnp.bfloat16)
        zpad = jnp.zeros((conv_pad, cp), jnp.bfloat16)
        ap = jnp.concatenate([zpad, a, zpad], axis=0)        # zero-padded conv input
        l_conv = l_in + 2 * conv_pad - k + 1

        # Conv1d as K accumulated shifted matmuls (bf16 operands, f32 acc).
        acc = jnp.zeros((l_conv, cp), jnp.float32)
        for kk in range(k):
            acc = acc + jnp.dot(ap[kk:kk + l_conv, :], w_ref[kk],
                                preferred_element_type=jnp.float32)
        y = jnp.maximum(acc + b_ref[...], 0.0)               # bias + ReLU, (l_conv, cp)

        # MaxPool1d(kernel=2, stride=2, padding=1).  Inputs are post-ReLU
        # (>= 0) so zero padding is equivalent to PyTorch's -inf padding.
        l_pool = l_conv // 2 + 1
        rows = [y[0:1]]                                      # window [pad, y0]
        for i in range(1, l_pool):
            lo = 2 * i - 1
            if lo + 1 < l_conv:
                rows.append(jnp.maximum(y[lo:lo + 1], y[lo + 1:lo + 2]))
            else:
                rows.append(y[lo:lo + 1])                    # window [y_last, pad]
        return jnp.concatenate(rows, axis=0)                 # (l_pool, cp) f32

    a = conv_bn_relu_pool(x_ref[0], w1_ref, b1_ref)
    a = conv_bn_relu_pool(a, w2_ref, b2_ref)
    a = conv_bn_relu_pool(a, w3_ref, b3_ref)
    # Temporal mean-pool: emit the sum; the 1/T factor is folded into proj_w1.
    ctx_ref[0] = jnp.sum(a, axis=0, keepdims=True)


def _proj_contrast_kernel(ctx_ref, w1_ref, b1_ref, w2_ref, b2_ref,
                          z_ref, logits_ref, *, inv_temp, batch):
    """Fused projection MLP + L2 normalization + contextual-contrast logits.

    ctx_ref: (2B, CP) f32 temporal sums; w1/w2: (CP, CP) bf16 zero-padded;
    z_ref:   (2B, CP) f32 (un-normalized projections, lane-padded);
    logits_ref: (B, B) f32 cosine(z_q, z_k) / temperature.
    """
    ctx = ctx_ref[...].astype(jnp.bfloat16)
    h = jnp.dot(ctx, w1_ref[...], preferred_element_type=jnp.float32) + b1_ref[...]
    h = jnp.maximum(h, 0.0)
    z = jnp.dot(h.astype(jnp.bfloat16), w2_ref[...],
                preferred_element_type=jnp.float32) + b2_ref[...]
    z_ref[...] = z

    zn = z * jax.lax.rsqrt(jnp.sum(z * z, axis=-1, keepdims=True) + 1e-12)
    sim = jax.lax.dot_general(zn[:batch], zn[batch:],
                              (((1,), (1,)), ((), ())),
                              preferred_element_type=jnp.float32)
    logits_ref[...] = sim * inv_temp


# ----------------------------------------------------------------------------
# pallas_call wrappers
# ----------------------------------------------------------------------------
_VMEM_SPEC = pl.BlockSpec(memory_space=pltpu.MemorySpace.VMEM)


def fused_encoder(x, w1, b1, w2, b2, w3, b3, *, conv_pad):
    """x: (2B, L, CP) bf16 -> temporal-sum context vectors (2B, 1, CP) f32."""
    n, l_in, cp = x.shape

    def rep3(shape):
        return pl.BlockSpec(shape, lambda b: (0, 0, 0))

    def rep2(shape):
        return pl.BlockSpec(shape, lambda b: (0, 0))

    return pl.pallas_call(
        functools.partial(_encoder_kernel, conv_pad=conv_pad),
        out_shape=jax.ShapeDtypeStruct((n, 1, cp), jnp.float32),
        grid=(n,),
        in_specs=[
            pl.BlockSpec((1, l_in, cp), lambda b: (b, 0, 0)),
            rep3(w1.shape), rep2(b1.shape),
            rep3(w2.shape), rep2(b2.shape),
            rep3(w3.shape), rep2(b3.shape),
        ],
        out_specs=pl.BlockSpec((1, 1, cp), lambda b: (b, 0, 0)),
        compiler_params=pltpu.CompilerParams(
            dimension_semantics=("parallel",)),
    )(x, w1, b1, w2, b2, w3, b3)


def proj_contrast(ctx, w1, b1, w2, b2, *, batch, temperature):
    """ctx: (2B, CP) -> (z_all (2B, CP), logits (B, B))."""
    n, cp = ctx.shape
    return pl.pallas_call(
        functools.partial(_proj_contrast_kernel,
                          inv_temp=1.0 / temperature, batch=batch),
        out_shape=(jax.ShapeDtypeStruct((n, cp), jnp.float32),
                   jax.ShapeDtypeStruct((batch, batch), jnp.float32)),
        in_specs=[_VMEM_SPEC] * 5,
        out_specs=(_VMEM_SPEC, _VMEM_SPEC),
    )(ctx, w1, b1, w2, b2)


# ----------------------------------------------------------------------------
# One-time parameter preparation (BN fold, transpose, lane-pad, bf16 cast)
# ----------------------------------------------------------------------------
def prepare_params(params, *, in_len, eps=1e-5):
    prep = {}
    for i in (1, 2, 3):
        w = params[f"w{i}"]                               # (Cout, Cin, K) PyTorch layout
        cout, cin, _ = w.shape
        scale = params[f"bn{i}_g"] / jnp.sqrt(params[f"bn{i}_v"] + eps)
        w_k = jnp.transpose(w, (2, 1, 0)) * scale[None, None, :]   # (K, Cin, Cout)
        b_f = (params[f"b{i}"] - params[f"bn{i}_m"]) * scale + params[f"bn{i}_b"]
        prep[f"w{i}"] = jnp.pad(
            w_k, ((0, 0), (0, CP - cin), (0, CP - cout))).astype(jnp.bfloat16)
        prep[f"b{i}"] = jnp.pad(
            b_f[None, :], ((0, 0), (0, CP - cout))).astype(jnp.float32)

    # Final temporal length after the three conv(+pool) blocks; fold the 1/T of
    # the temporal mean-pool into proj_w1 so the encoder kernel only emits a sum.
    t = in_len
    for _ in range(3):
        t = t + 2 * CONV_PAD - KSIZE + 1          # conv ("same" for odd K)
        t = t // 2 + 1                            # MaxPool1d(2, 2, padding=1)

    prep["pw1"] = jnp.pad(params["proj_w1"] / float(t),
                          ((0, CP - C3), (0, CP - HIDDEN))).astype(jnp.bfloat16)
    prep["pb1"] = jnp.pad(params["proj_b1"],
                          ((0, 0), (0, CP - HIDDEN))).astype(jnp.float32)
    prep["pw2"] = jnp.pad(params["proj_w2"],
                          ((0, CP - HIDDEN), (0, CP - PROJ))).astype(jnp.bfloat16)
    prep["pb2"] = jnp.pad(params["proj_b2"],
                          ((0, 0), (0, CP - PROJ))).astype(jnp.float32)
    return prep


# ----------------------------------------------------------------------------
# Forward pass
# ----------------------------------------------------------------------------
def tstcc_forward(prep, x_q, x_k):
    b = x_q.shape[0]
    # Batch the two augmented views -> single encoder / projection pass.
    x = jnp.concatenate([x_q, x_k], axis=0)                # (2B, Cin, L) NCL
    x = jnp.transpose(x, (0, 2, 1))                        # (2B, L, Cin) channels-last
    x = jnp.pad(x, ((0, 0), (0, 0), (0, CP - x.shape[-1]))).astype(jnp.bfloat16)

    ctx = fused_encoder(x, prep["w1"], prep["b1"], prep["w2"], prep["b2"],
                        prep["w3"], prep["b3"], conv_pad=CONV_PAD)
    ctx = ctx.reshape(2 * b, CP)

    z_all, logits = proj_contrast(ctx, prep["pw1"], prep["pb1"],
                                  prep["pw2"], prep["pb2"],
                                  batch=b, temperature=TEMPERATURE)
    z = z_all[:, :PROJ]
    return logits, z[:b], z[b:]


# ----------------------------------------------------------------------------
# Pure-JAX reference (mirrors the kernel math, incl. bf16 operand casts)
# ----------------------------------------------------------------------------
def reference_forward(params, x_q, x_k, *, eps=1e-5):
    x = jnp.concatenate([x_q, x_k], axis=0)
    x = jnp.transpose(x, (0, 2, 1))                        # (2B, L, Cin)
    for i in (1, 2, 3):
        w = params[f"w{i}"]
        scale = params[f"bn{i}_g"] / jnp.sqrt(params[f"bn{i}_v"] + eps)
        wk = (jnp.transpose(w, (2, 1, 0)) * scale[None, None, :]).astype(jnp.bfloat16)
        bf = (params[f"b{i}"] - params[f"bn{i}_m"]) * scale + params[f"bn{i}_b"]
        n, l_in, _ = x.shape
        xp = jnp.pad(x.astype(jnp.bfloat16),
                     ((0, 0), (CONV_PAD, CONV_PAD), (0, 0)))
        l_conv = l_in + 2 * CONV_PAD - KSIZE + 1
        y = jnp.zeros((n, l_conv, wk.shape[-1]), jnp.float32)
        for k in range(KSIZE):
            y = y + jnp.einsum("blc,co->blo", xp[:, k:k + l_conv, :], wk[k],
                               preferred_element_type=jnp.float32)
        y = jnp.maximum(y + bf[None, None, :], 0.0)
        l_pool = l_conv // 2 + 1
        yp = jnp.pad(y, ((0, 0), (1, 1), (0, 0)))[:, :2 * l_pool, :]
        x = jnp.max(yp.reshape(n, l_pool, 2, -1), axis=2)

    t_feat = x.shape[1]
    ctx = jnp.sum(x, axis=1)
    w1_eff = (params["proj_w1"] / float(t_feat)).astype(jnp.bfloat16)
    h = jnp.dot(ctx.astype(jnp.bfloat16), w1_eff,
                preferred_element_type=jnp.float32) + params["proj_b1"]
    h = jnp.maximum(h, 0.0)
    z = jnp.dot(h.astype(jnp.bfloat16), params["proj_w2"].astype(jnp.bfloat16),
                preferred_element_type=jnp.float32) + params["proj_b2"]
    zn = z * jax.lax.rsqrt(jnp.sum(z * z, axis=-1, keepdims=True) + 1e-12)
    b = x_q.shape[0]
    logits = jnp.dot(zn[:b], zn[b:].T,
                     preferred_element_type=jnp.float32) * (1.0 / TEMPERATURE)
    return logits, z[:b], z[b:]


# ----------------------------------------------------------------------------
# Deterministic parameter init (PyTorch-layout raw params)
# ----------------------------------------------------------------------------
def init_params(key):
    ks = jax.random.split(key, 5)

    def conv_p(k, cin, cout, idx):
        return {
            f"w{idx}": 0.1 * jax.random.normal(k, (cout, cin, KSIZE), jnp.float32),
            f"b{idx}": jnp.zeros((cout,), jnp.float32),
            f"bn{idx}_g": jnp.ones((cout,), jnp.float32),
            f"bn{idx}_b": jnp.zeros((cout,), jnp.float32),
            f"bn{idx}_m": jnp.zeros((cout,), jnp.float32),
            f"bn{idx}_v": jnp.ones((cout,), jnp.float32),
        }

    params = {}
    params.update(conv_p(ks[0], C_IN, C1, 1))
    params.update(conv_p(ks[1], C1, C2, 2))
    params.update(conv_p(ks[2], C2, C3, 3))
    params["proj_w1"] = 0.1 * jax.random.normal(ks[3], (C3, HIDDEN), jnp.float32)
    params["proj_b1"] = jnp.zeros((1, HIDDEN), jnp.float32)
    params["proj_w2"] = 0.1 * jax.random.normal(ks[4], (HIDDEN, PROJ), jnp.float32)
    params["proj_b2"] = jnp.zeros((1, PROJ), jnp.float32)
    return params


if __name__ == "__main__":
    key = jax.random.PRNGKey(0)
    k_p, k_q, k_k = jax.random.split(key, 3)
    params = init_params(k_p)

    B, L = 2, 16
    x_q = jax.random.normal(k_q, (B, C_IN, L), jnp.float32)   # NCL, like PyTorch Conv1d
    x_k = jax.random.normal(k_k, (B, C_IN, L), jnp.float32)

    prep = prepare_params(params, in_len=L)                    # one-time weight prep

    fwd = jax.jit(tstcc_forward)
    logits, z_q, z_k = fwd(prep, x_q, x_k)
    jax.block_until_ready((logits, z_q, z_k))

    ref_logits, ref_zq, ref_zk = jax.jit(reference_forward)(params, x_q, x_k)
    jax.block_until_ready((ref_logits, ref_zq, ref_zk))

    assert logits.shape == (B, B)
    assert z_q.shape == (B, PROJ) and z_k.shape == (B, PROJ)
    assert bool(jnp.all(jnp.isfinite(logits)))
    assert bool(jnp.allclose(logits, ref_logits, atol=5e-2, rtol=5e-2))
    assert bool(jnp.allclose(z_q, ref_zq, atol=5e-3, rtol=5e-2))
    assert bool(jnp.allclose(z_k, ref_zk, atol=5e-3, rtol=5e-2))
    print("KERNEL_OK")
</pallas_src>

<mosaic_0001>
module attributes {stable_mosaic.version = 11 : i64} {
  func.func @_proj_contrast_kernel(%arg0: memref<4x128xf32, #tpu.memory_space<vmem>>, %arg1: memref<128x128xbf16, #tpu.memory_space<vmem>>, %arg2: memref<1x128xf32, #tpu.memory_space<vmem>>, %arg3: memref<128x128xbf16, #tpu.memory_space<vmem>>, %arg4: memref<1x128xf32, #tpu.memory_space<vmem>>, %arg5: memref<4x128xf32, #tpu.memory_space<vmem>>, %arg6: memref<2x2xf32, #tpu.memory_space<vmem>>) attributes {dimension_semantics = [], scalar_prefetch = 0 : i64, scratch_operands = 0 : i64, tpu.core_type = #tpu.core_type<tc>} {
    %c0 = arith.constant 0 : index
    %c0_0 = arith.constant 0 : index
    %0 = vector.load %arg0[%c0, %c0_0] : memref<4x128xf32, #tpu.memory_space<vmem>>, vector<4x128xf32>
    %1 = arith.truncf %0 : vector<4x128xf32> to vector<4x128xbf16>
    %c0_1 = arith.constant 0 : index
    %c0_2 = arith.constant 0 : index
    %2 = vector.load %arg1[%c0_1, %c0_2] : memref<128x128xbf16, #tpu.memory_space<vmem>>, vector<128x128xbf16>
    %cst = arith.constant dense<0.000000e+00> : vector<4x128xf32>
    %3 = tpu.matmul %1, %2, %cst {dimension_numbers = #tpu.dot_dimension_numbers<[1], [0], [0], [1], [0, 0, 1, 1], [], []>} : vector<4x128xbf16>, vector<128x128xbf16>, vector<4x128xf32> -> vector<4x128xf32>
    %c0_3 = arith.constant 0 : index
    %c0_4 = arith.constant 0 : index
    %4 = vector.load %arg2[%c0_3, %c0_4] : memref<1x128xf32, #tpu.memory_space<vmem>>, vector<1x128xf32>
    %5 = vector.broadcast %4 : vector<1x128xf32> to vector<4x128xf32>
    %6 = arith.addf %3, %5 : vector<4x128xf32>
    %cst_5 = arith.constant 0.000000e+00 : f32
    %7 = vector.broadcast %cst_5 : f32 to vector<4x128xf32>
    %8 = arith.maximumf %6, %7 : vector<4x128xf32>
    %9 = arith.truncf %8 : vector<4x128xf32> to vector<4x128xbf16>
    %c0_6 = arith.constant 0 : index
    %c0_7 = arith.constant 0 : index
    %10 = vector.load %arg3[%c0_6, %c0_7] : memref<128x128xbf16, #tpu.memory_space<vmem>>, vector<128x128xbf16>
    %cst_8 = arith.constant dense<0.000000e+00> : vector<4x128xf32>
    %11 = tpu.matmul %9, %10, %cst_8 {dimension_numbers = #tpu.dot_dimension_numbers<[1], [0], [0], [1], [0, 0, 1, 1], [], []>} : vector<4x128xbf16>, vector<128x128xbf16>, vector<4x128xf32> -> vector<4x128xf32>
    %c0_9 = arith.constant 0 : index
    %c0_10 = arith.constant 0 : index
    %12 = vector.load %arg4[%c0_9, %c0_10] : memref<1x128xf32, #tpu.memory_space<vmem>>, vector<1x128xf32>
    %13 = vector.broadcast %12 : vector<1x128xf32> to vector<4x128xf32>
    %14 = arith.addf %11, %13 : vector<4x128xf32>
    %c0_11 = arith.constant 0 : index
    %c0_12 = arith.constant 0 : index
    %15 = vector.load %arg5[%c0_11, %c0_12] : memref<4x128xf32, #tpu.memory_space<vmem>>, vector<4x128xf32>
    tpu.vector_store %arg5[%c0_11, %c0_12], %14 {strides = array<i32>} : memref<4x128xf32, #tpu.memory_space<vmem>>, vector<4x128xf32>,
    %16 = arith.mulf %14, %14 : vector<4x128xf32>
    %cst_13 = arith.constant dense<0.000000e+00> : vector<4xf32>
    %17 = vector.multi_reduction <add>, %16, %cst_13 [1] : vector<4x128xf32> to vector<4xf32>
    %18 = vector.shape_cast %17 : vector<4xf32> to vector<4x1xf32>
    %cst_14 = arith.constant 9.99999996E-13 : f32
    %19 = vector.broadcast %cst_14 : f32 to vector<4x1xf32>
    %20 = arith.addf %18, %19 : vector<4x1xf32>
    %21 = math.rsqrt %20 : vector<4x1xf32>
    %22 = vector.broadcast %21 : vector<4x1xf32> to vector<4x128xf32>
    %23 = arith.mulf %14, %22 : vector<4x128xf32>
    %24 = vector.extract_strided_slice %23 {offsets = [0, 0], sizes = [2, 128], strides = [1, 1]} : vector<4x128xf32> to vector<2x128xf32>
    %25 = vector.extract_strided_slice %23 {offsets = [2, 0], sizes = [2, 128], strides = [1, 1]} : vector<4x128xf32> to vector<2x128xf32>
    %cst_15 = arith.constant dense<0.000000e+00> : vector<2x2xf32>
    %26 = tpu.matmul %24, %25, %cst_15 {dimension_numbers = #tpu.dot_dimension_numbers<[1], [1], [0], [0], [0, 0, 1, 0], [], []>} : vector<2x128xf32>, vector<2x128xf32>, vector<2x2xf32> -> vector<2x2xf32>
    %cst_16 = arith.constant 5.000000e+00 : f32
    %27 = vector.broadcast %cst_16 : f32 to vector<2x2xf32>
    %28 = arith.mulf %26, %27 : vector<2x2xf32>
    %c0_17 = arith.constant 0 : index
    %c0_18 = arith.constant 0 : index
    %29 = vector.load %arg6[%c0_17, %c0_18] : memref<2x2xf32, #tpu.memory_space<vmem>>, vector<2x2xf32>
    tpu.vector_store %arg6[%c0_17, %c0_18], %28 {strides = array<i32>} : memref<2x2xf32, #tpu.memory_space<vmem>>, vector<2x2xf32>,
    return
  }
}

module attributes {stable_mosaic.version = 11 : i64} {
  func.func @_encoder_kernel(%arg0: i32, %arg1: memref<1x16x128xbf16, #tpu.memory_space<vmem>>, %arg2: memref<7x128x128xbf16, #tpu.memory_space<vmem>>, %arg3: memref<1x128xf32, #tpu.memory_space<vmem>>, %arg4: memref<7x128x128xbf16, #tpu.memory_space<vmem>>, %arg5: memref<1x128xf32, #tpu.memory_space<vmem>>, %arg6: memref<7x128x128xbf16, #tpu.memory_space<vmem>>, %arg7: memref<1x128xf32, #tpu.memory_space<vmem>>, %arg8: memref<1x1x128xf32, #tpu.memory_space<vmem>>) attributes {dimension_semantics = [#tpu.dimension_semantics<parallel>], iteration_bounds = array<i64: 4>, scalar_prefetch = 0 : i64, scratch_operands = 0 : i64, tpu.core_type = #tpu.core_type<tc>, window_params = [{transform_indices = @transform_0, window_bounds = array<i64: 1, 16, 128>}, {pipeline_mode = #tpu.pipeline_mode<synchronous>, transform_indices = @transform_1, window_bounds = array<i64: 7, 128, 128>}, {pipeline_mode = #tpu.pipeline_mode<synchronous>, transform_indices = @transform_2, window_bounds = array<i64: 1, 128>}, {pipeline_mode = #tpu.pipeline_mode<synchronous>, transform_indices = @transform_3, window_bounds = array<i64: 7, 128, 128>}, {pipeline_mode = #tpu.pipeline_mode<synchronous>, transform_indices = @transform_4, window_bounds = array<i64: 1, 128>}, {pipeline_mode = #tpu.pipeline_mode<synchronous>, transform_indices = @transform_5, window_bounds = array<i64: 7, 128, 128>}, {pipeline_mode = #tpu.pipeline_mode<synchronous>, transform_indices = @transform_6, window_bounds = array<i64: 1, 128>}, {transform_indices = @transform_7, window_bounds = array<i64: 1, 1, 128>}]} {
    %c0 = arith.constant 0 : index
    %c0_0 = arith.constant 0 : index
    %c0_1 = arith.constant 0 : index
    %0 = vector.load %arg1[%c0, %c0_0, %c0_1] : memref<1x16x128xbf16, #tpu.memory_space<vmem>>, vector<1x16x128xbf16>
    %1 = vector.shape_cast %0 : vector<1x16x128xbf16> to vector<16x128xbf16>
    %cst = arith.constant 0.000000e+00 : bf16
    %2 = vector.broadcast %cst : bf16 to vector<3x128xbf16>
    %3 = tpu.concatenate %2, %1, %2 in 0 : vector<3x128xbf16>, vector<16x128xbf16>, vector<3x128xbf16> -> vector<22x128xbf16>
    %cst_2 = arith.constant 0.000000e+00 : f32
    %4 = vector.broadcast %cst_2 : f32 to vector<16x128xf32>
    %5 = vector.extract_strided_slice %3 {offsets = [0, 0], sizes = [16, 128], strides = [1, 1]} : vector<22x128xbf16> to vector<16x128xbf16>
    %c0_3 = arith.constant 0 : index
    %c0_4 = arith.constant 0 : index
    %c0_5 = arith.constant 0 : index
    %6 = vector.load %arg2[%c0_3, %c0_4, %c0_5] : memref<7x128x128xbf16, #tpu.memory_space<vmem>>, vector<1x128x128xbf16>
    %7 = vector.shape_cast %6 : vector<1x128x128xbf16> to vector<128x128xbf16>
    %cst_6 = arith.constant dense<0.000000e+00> : vector<16x128xf32>
    %8 = tpu.matmul %5, %7, %cst_6 {dimension_numbers = #tpu.dot_dimension_numbers<[1], [0], [0], [1], [0, 0, 1, 1], [], []>} : vector<16x128xbf16>, vector<128x128xbf16>, vector<16x128xf32> -> vector<16x128xf32>
    %9 = arith.addf %4, %8 : vector<16x128xf32>
    %10 = vector.extract_strided_slice %3 {offsets = [1, 0], sizes = [16, 128], strides = [1, 1]} : vector<22x128xbf16> to vector<16x128xbf16>
    %c1 = arith.constant 1 : index
    %c0_7 = arith.constant 0 : index
    %c0_8 = arith.constant 0 : index
    %11 = vector.load %arg2[%c1, %c0_7, %c0_8] : memref<7x128x128xbf16, #tpu.memory_space<vmem>>, vector<1x128x128xbf16>
    %12 = vector.shape_cast %11 : vector<1x128x128xbf16> to vector<128x128xbf16>
    %cst_9 = arith.constant dense<0.000000e+00> : vector<16x128xf32>
    %13 = tpu.matmul %10, %12, %cst_9 {dimension_numbers = #tpu.dot_dimension_numbers<[1], [0], [0], [1], [0, 0, 1, 1], [], []>} : vector<16x128xbf16>, vector<128x128xbf16>, vector<16x128xf32> -> vector<16x128xf32>
    %14 = arith.addf %9, %13 : vector<16x128xf32>
    %15 = vector.extract_strided_slice %3 {offsets = [2, 0], sizes = [16, 128], strides = [1, 1]} : vector<22x128xbf16> to vector<16x128xbf16>
    %c2 = arith.constant 2 : index
    %c0_10 = arith.constant 0 : index
    %c0_11 = arith.constant 0 : index
    %16 = vector.load %arg2[%c2, %c0_10, %c0_11] : memref<7x128x128xbf16, #tpu.memory_space<vmem>>, vector<1x128x128xbf16>
    %17 = vector.shape_cast %16 : vector<1x128x128xbf16> to vector<128x128xbf16>
    %cst_12 = arith.constant dense<0.000000e+00> : vector<16x128xf32>
    %18 = tpu.matmul %15, %17, %cst_12 {dimension_numbers = #tpu.dot_dimension_numbers<[1], [0], [0], [1], [0, 0, 1, 1], [], []>} : vector<16x128xbf16>, vector<128x128xbf16>, vector<16x128xf32> -> vector<16x128xf32>
    %19 = arith.addf %14, %18 : vector<16x128xf32>
    %20 = vector.extract_strided_slice %3 {offsets = [3, 0], sizes = [16, 128], strides = [1, 1]} : vector<22x128xbf16> to vector<16x128xbf16>
    %c3 = arith.constant 3 : index
    %c0_13 = arith.constant 0 : index
    %c0_14 = arith.constant 0 : index
    %21 = vector.load %arg2[%c3, %c0_13, %c0_14] : memref<7x128x128xbf16, #tpu.memory_space<vmem>>, vector<1x128x128xbf16>
    %22 = vector.shape_cast %21 : vector<1x128x128xbf16> to vector<128x128xbf16>
    %cst_15 = arith.constant dense<0.000000e+00> : vector<16x128xf32>
    %23 = tpu.matmul %20, %22, %cst_15 {dimension_numbers = #tpu.dot_dimension_numbers<[1], [0], [0], [1], [0, 0, 1, 1], [], []>} : vector<16x128xbf16>, vector<128x128xbf16>, vector<16x128xf32> -> vector<16x128xf32>
    %24 = arith.addf %19, %23 : vector<16x128xf32>
    %25 = vector.extract_strided_slice %3 {offsets = [4, 0], sizes = [16, 128], strides = [1, 1]} : vector<22x128xbf16> to vector<16x128xbf16>
    %c4 = arith.constant 4 : index
    %c0_16 = arith.constant 0 : index
    %c0_17 = arith.constant 0 : index
    %26 = vector.load %arg2[%c4, %c0_16, %c0_17] : memref<7x128x128xbf16, #tpu.memory_space<vmem>>, vector<1x128x128xbf16>
    %27 = vector.shape_cast %26 : vector<1x128x128xbf16> to vector<128x128xbf16>
    %cst_18 = arith.constant dense<0.000000e+00> : vector<16x128xf32>
    %28 = tpu.matmul %25, %27, %cst_18 {dimension_numbers = #tpu.dot_dimension_numbers<[1], [0], [0], [1], [0, 0, 1, 1], [], []>} : vector<16x128xbf16>, vector<128x128xbf16>, vector<16x128xf32> -> vector<16x128xf32>
    %29 = arith.addf %24, %28 : vector<16x128xf32>
    %30 = vector.extract_strided_slice %3 {offsets = [5, 0], sizes = [16, 128], strides = [1, 1]} : vector<22x128xbf16> to vector<16x128xbf16>
    %c5 = arith.constant 5 : index
    %c0_19 = arith.constant 0 : index
    %c0_20 = arith.constant 0 : index
    %31 = vector.load %arg2[%c5, %c0_19, %c0_20] : memref<7x128x128xbf16, #tpu.memory_space<vmem>>, vector<1x128x128xbf16>
    %32 = vector.shape_cast %31 : vector<1x128x128xbf16> to vector<128x128xbf16>
    %cst_21 = arith.constant dense<0.000000e+00> : vector<16x128xf32>
    %33 = tpu.matmul %30, %32, %cst_21 {dimension_numbers = #tpu.dot_dimension_numbers<[1], [0], [0], [1], [0, 0, 1, 1], [], []>} : vector<16x128xbf16>, vector<128x128xbf16>, vector<16x128xf32> -> vector<16x128xf32>
    %34 = arith.addf %29, %33 : vector<16x128xf32>
    %35 = vector.extract_strided_slice %3 {offsets = [6, 0], sizes = [16, 128], strides = [1, 1]} : vector<22x128xbf16> to vector<16x128xbf16>
    %c6 = arith.constant 6 : index
    %c0_22 = arith.constant 0 : index
    %c0_23 = arith.constant 0 : index
    %36 = vector.load %arg2[%c6, %c0_22, %c0_23] : memref<7x128x128xbf16, #tpu.memory_space<vmem>>, vector<1x128x128xbf16>
    %37 = vector.shape_cast %36 : vector<1x128x128xbf16> to vector<128x128xbf16>
    %cst_24 = arith.constant dense<0.000000e+00> : vector<16x128xf32>
    %38 = tpu.matmul %35, %37, %cst_24 {dimension_numbers = #tpu.dot_dimension_numbers<[1], [0], [0], [1], [0, 0, 1, 1], [], []>} : vector<16x128xbf16>, vector<128x128xbf16>, vector<16x128xf32> -> vector<16x128xf32>
    %39 = arith.addf %34, %38 : vector<16x128xf32>
    %c0_25 = arith.constant 0 : index
    %c0_26 = arith.constant 0 : index
    %40 = vector.load %arg3[%c0_25, %c0_26] : memref<1x128xf32, #tpu.memory_space<vmem>>, vector<1x128xf32>
    %41 = vector.broadcast %40 : vector<1x128xf32> to vector<16x128xf32>
    %42 = arith.addf %39, %41 : vector<16x128xf32>
    %cst_27 = arith.constant 0.000000e+00 : f32
    %43 = vector.broadcast %cst_27 : f32 to vector<16x128xf32>
    %44 = arith.maximumf %42, %43 : vector<16x128xf32>
    %45 = vector.extract_strided_slice %44 {offsets = [0, 0], sizes = [1, 128], strides = [1, 1]} : vector<16x128xf32> to vector<1x128xf32>
    %46 = vector.extract_strided_slice %44 {offsets = [1, 0], sizes = [1, 128], strides = [1, 1]} : vector<16x128xf32> to vector<1x128xf32>
    %47 = vector.extract_strided_slice %44 {offsets = [2, 0], sizes = [1, 128], strides = [1, 1]} : vector<16x128xf32> to vector<1x128xf32>
    %48 = arith.maximumf %46, %47 : vector<1x128xf32>
    %49 = vector.extract_strided_slice %44 {offsets = [3, 0], sizes = [1, 128], strides = [1, 1]} : vector<16x128xf32> to vector<1x128xf32>
    %50 = vector.extract_strided_slice %44 {offsets = [4, 0], sizes = [1, 128], strides = [1, 1]} : vector<16x128xf32> to vector<1x128xf32>
    %51 = arith.maximumf %49, %50 : vector<1x128xf32>
    %52 = vector.extract_strided_slice %44 {offsets = [5, 0], sizes = [1, 128], strides = [1, 1]} : vector<16x128xf32> to vector<1x128xf32>
    %53 = vector.extract_strided_slice %44 {offsets = [6, 0], sizes = [1, 128], strides = [1, 1]} : vector<16x128xf32> to vector<1x128xf32>
    %54 = arith.maximumf %52, %53 : vector<1x128xf32>
    %55 = vector.extract_strided_slice %44 {offsets = [7, 0], sizes = [1, 128], strides = [1, 1]} : vector<16x128xf32> to vector<1x128xf32>
    %56 = vector.extract_strided_slice %44 {offsets = [8, 0], sizes = [1, 128], strides = [1, 1]} : vector<16x128xf32> to vector<1x128xf32>
    %57 = arith.maximumf %55, %56 : vector<1x128xf32>
    %58 = vector.extract_strided_slice %44 {offsets = [9, 0], sizes = [1, 128], strides = [1, 1]} : vector<16x128xf32> to vector<1x128xf32>
    %59 = vector.extract_strided_slice %44 {offsets = [10, 0], sizes = [1, 128], strides = [1, 1]} : vector<16x128xf32> to vector<1x128xf32>
    %60 = arith.maximumf %58, %59 : vector<1x128xf32>
    %61 = vector.extract_strided_slice %44 {offsets = [11, 0], sizes = [1, 128], strides = [1, 1]} : vector<16x128xf32> to vector<1x128xf32>
    %62 = vector.extract_strided_slice %44 {offsets = [12, 0], sizes = [1, 128], strides = [1, 1]} : vector<16x128xf32> to vector<1x128xf32>
    %63 = arith.maximumf %61, %62 : vector<1x128xf32>
    %64 = vector.extract_strided_slice %44 {offsets = [13, 0], sizes = [1, 128], strides = [1, 1]} : vector<16x128xf32> to vector<1x128xf32>
    %65 = vector.extract_strided_slice %44 {offsets = [14, 0], sizes = [1, 128], strides = [1, 1]} : vector<16x128xf32> to vector<1x128xf32>
    %66 = arith.maximumf %64, %65 : vector<1x128xf32>
    %67 = vector.extract_strided_slice %44 {offsets = [15, 0], sizes = [1, 128], strides = [1, 1]} : vector<16x128xf32> to vector<1x128xf32>
    %68 = tpu.concatenate %45, %48, %51, %54, %57, %60, %63, %66, %67 in 0 : vector<1x128xf32>, vector<1x128xf32>, vector<1x128xf32>, vector<1x128xf32>, vector<1x128xf32>, vector<1x128xf32>, vector<1x128xf32>, vector<1x128xf32>, vector<1x128xf32> -> vector<9x128xf32>
    %69 = arith.truncf %68 : vector<9x128xf32> to vector<9x128xbf16>
    %cst_28 = arith.constant 0.000000e+00 : bf16
    %70 = vector.broadcast %cst_28 : bf16 to vector<3x128xbf16>
    %71 = tpu.concatenate %70, %69, %70 in 0 : vector<3x128xbf16>, vector<9x128xbf16>, vector<3x128xbf16> -> vector<15x128xbf16>
    %cst_29 = arith.constant 0.000000e+00 : f32
    %72 = vector.broadcast %cst_29 : f32 to vector<9x128xf32>
    %73 = vector.extract_strided_slice %71 {offsets = [0, 0], sizes = [9, 128], strides = [1, 1]} : vector<15x128xbf16> to vector<9x128xbf16>
    %c0_30 = arith.constant 0 : index
    %c0_31 = arith.constant 0 : index
    %c0_32 = arith.constant 0 : index
    %74 = vector.load %arg4[%c0_30, %c0_31, %c0_32] : memref<7x128x128xbf16, #tpu.memory_space<vmem>>, vector<1x128x128xbf16>
    %75 = vector.shape_cast %74 : vector<1x128x128xbf16> to vector<128x128xbf16>
    %cst_33 = arith.constant dense<0.000000e+00> : vector<9x128xf32>
    %76 = tpu.matmul %73, %75, %cst_33 {dimension_numbers = #tpu.dot_dimension_numbers<[1], [0], [0], [1], [0, 0, 1, 1], [], []>} : vector<9x128xbf16>, vector<128x128xbf16>, vector<9x128xf32> -> vector<9x128xf32>
    %77 = arith.addf %72, %76 : vector<9x128xf32>
    %78 = vector.extract_strided_slice %71 {offsets = [1, 0], sizes = [9, 128], strides = [1, 1]} : vector<15x128xbf16> to vector<9x128xbf16>
    %c1_34 = arith.constant 1 : index
    %c0_35 = arith.constant 0 : index
    %c0_36 = arith.constant 0 : index
    %79 = vector.load %arg4[%c1_34, %c0_35, %c0_36] : memref<7x128x128xbf16, #tpu.memory_space<vmem>>, vector<1x128x128xbf16>
    %80 = vector.shape_cast %79 : vector<1x128x128xbf16> to vector<128x128xbf16>
    %cst_37 = arith.constant dense<0.000000e+00> : vector<9x128xf32>
    %81 = tpu.matmul %78, %80, %cst_37 {dimension_numbers = #tpu.dot_dimension_numbers<[1], [0], [0], [1], [0, 0, 1, 1], [], []>} : vector<9x128xbf16>, vector<128x128xbf16>, vector<9x128xf32> -> vector<9x128xf32>
    %82 = arith.addf %77, %81 : vector<9x128xf32>
    %83 = vector.extract_strided_slice %71 {offsets = [2, 0], sizes = [9, 128], strides = [1, 1]} : vector<15x128xbf16> to vector<9x128xbf16>
    %c2_38 = arith.constant 2 : index
    %c0_39 = arith.constant 0 : index
    %c0_40 = arith.constant 0 : index
    %84 = vector.load %arg4[%c2_38, %c0_39, %c0_40] : memref<7x128x128xbf16, #tpu.memory_space<vmem>>, vector<1x128x128xbf16>
    %85 = vector.shape_cast %84 : vector<1x128x128xbf16> to vector<128x128xbf16>
    %cst_41 = arith.constant dense<0.000000e+00> : vector<9x128xf32>
    %86 = tpu.matmul %83, %85, %cst_41 {dimension_numbers = #tpu.dot_dimension_numbers<[1], [0], [0], [1], [0, 0, 1, 1], [], []>} : vector<9x128xbf16>, vector<128x128xbf16>, vector<9x128xf32> -> vector<9x128xf32>
    %87 = arith.addf %82, %86 : vector<9x128xf32>
    %88 = vector.extract_strided_slice %71 {offsets = [3, 0], sizes = [9, 128], strides = [1, 1]} : vector<15x128xbf16> to vector<9x128xbf16>
    %c3_42 = arith.constant 3 : index
    %c0_43 = arith.constant 0 : index
    %c0_44 = arith.constant 0 : index
    %89 = vector.load %arg4[%c3_42, %c0_43, %c0_44] : memref<7x128x128xbf16, #tpu.memory_space<vmem>>, vector<1x128x128xbf16>
    %90 = vector.shape_cast %89 : vector<1x128x128xbf16> to vector<128x128xbf16>
    %cst_45 = arith.constant dense<0.000000e+00> : vector<9x128xf32>
    %91 = tpu.matmul %88, %90, %cst_45 {dimension_numbers = #tpu.dot_dimension_numbers<[1], [0], [0], [1], [0, 0, 1, 1], [], []>} : vector<9x128xbf16>, vector<128x128xbf16>, vector<9x128xf32> -> vector<9x128xf32>
    %92 = arith.addf %87, %91 : vector<9x128xf32>
    %93 = vector.extract_strided_slice %71 {offsets = [4, 0], sizes = [9, 128], strides = [1, 1]} : vector<15x128xbf16> to vector<9x128xbf16>
    %c4_46 = arith.constant 4 : index
    %c0_47 = arith.constant 0 : index
    %c0_48 = arith.constant 0 : index
    %94 = vector.load %arg4[%c4_46, %c0_47, %c0_48] : memref<7x128x128xbf16, #tpu.memory_space<vmem>>, vector<1x128x128xbf16>
    %95 = vector.shape_cast %94 : vector<1x128x128xbf16> to vector<128x128xbf16>
    %cst_49 = arith.constant dense<0.000000e+00> : vector<9x128xf32>
    %96 = tpu.matmul %93, %95, %cst_49 {dimension_numbers = #tpu.dot_dimension_numbers<[1], [0], [0], [1], [0, 0, 1, 1], [], []>} : vector<9x128xbf16>, vector<128x128xbf16>, vector<9x128xf32> -> vector<9x128xf32>
    %97 = arith.addf %92, %96 : vector<9x128xf32>
    %98 = vector.extract_strided_slice %71 {offsets = [5, 0], sizes = [9, 128], strides = [1, 1]} : vector<15x128xbf16> to vector<9x128xbf16>
    %c5_50 = arith.constant 5 : index
    %c0_51 = arith.constant 0 : index
    %c0_52 = arith.constant 0 : index
    %99 = vector.load %arg4[%c5_50, %c0_51, %c0_52] : memref<7x128x128xbf16, #tpu.memory_space<vmem>>, vector<1x128x128xbf16>
    %100 = vector.shape_cast %99 : vector<1x128x128xbf16> to vector<128x128xbf16>
    %cst_53 = arith.constant dense<0.000000e+00> : vector<9x128xf32>
    %101 = tpu.matmul %98, %100, %cst_53 {dimension_numbers = #tpu.dot_dimension_numbers<[1], [0], [0], [1], [0, 0, 1, 1], [], []>} : vector<9x128xbf16>, vector<128x128xbf16>, vector<9x128xf32> -> vector<9x128xf32>
    %102 = arith.addf %97, %101 : vector<9x128xf32>
    %103 = vector.extract_strided_slice %71 {offsets = [6, 0], sizes = [9, 128], strides = [1, 1]} : vector<15x128xbf16> to vector<9x128xbf16>
    %c6_54 = arith.constant 6 : index
    %c0_55 = arith.constant 0 : index
    %c0_56 = arith.constant 0 : index
    %104 = vector.load %arg4[%c6_54, %c0_55, %c0_56] : memref<7x128x128xbf16, #tpu.memory_space<vmem>>, vector<1x128x128xbf16>
    %105 = vector.shape_cast %104 : vector<1x128x128xbf16> to vector<128x128xbf16>
    %cst_57 = arith.constant dense<0.000000e+00> : vector<9x128xf32>
    %106 = tpu.matmul %103, %105, %cst_57 {dimension_numbers = #tpu.dot_dimension_numbers<[1], [0], [0], [1], [0, 0, 1, 1], [], []>} : vector<9x128xbf16>, vector<128x128xbf16>, vector<9x128xf32> -> vector<9x128xf32>
    %107 = arith.addf %102, %106 : vector<9x128xf32>
    %c0_58 = arith.constant 0 : index
    %c0_59 = arith.constant 0 : index
    %108 = vector.load %arg5[%c0_58, %c0_59] : memref<1x128xf32, #tpu.memory_space<vmem>>, vector<1x128xf32>
    %109 = vector.broadcast %108 : vector<1x128xf32> to vector<9x128xf32>
    %110 = arith.addf %107, %109 : vector<9x128xf32>
    %cst_60 = arith.constant 0.000000e+00 : f32
    %111 = vector.broadcast %cst_60 : f32 to vector<9x128xf32>
    %112 = arith.maximumf %110, %111 : vector<9x128xf32>
    %113 = vector.extract_strided_slice %112 {offsets = [0, 0], sizes = [1, 128], strides = [1, 1]} : vector<9x128xf32> to vector<1x128xf32>
    %114 = vector.extract_strided_slice %112 {offsets = [1, 0], sizes = [1, 128], strides = [1, 1]} : vector<9x128xf32> to vector<1x128xf32>
    %115 = vector.extract_strided_slice %112 {offsets = [2, 0], sizes = [1, 128], strides = [1, 1]} : vector<9x128xf32> to vector<1x128xf32>
    %116 = arith.maximumf %114, %115 : vector<1x128xf32>
    %117 = vector.extract_strided_slice %112 {offsets = [3, 0], sizes = [1, 128], strides = [1, 1]} : vector<9x128xf32> to vector<1x128xf32>
    %118 = vector.extract_strided_slice %112 {offsets = [4, 0], sizes = [1, 128], strides = [1, 1]} : vector<9x128xf32> to vector<1x128xf32>
    %119 = arith.maximumf %117, %118 : vector<1x128xf32>
    %120 = vector.extract_strided_slice %112 {offsets = [5, 0], sizes = [1, 128], strides = [1, 1]} : vector<9x128xf32> to vector<1x128xf32>
    %121 = vector.extract_strided_slice %112 {offsets = [6, 0], sizes = [1, 128], strides = [1, 1]} : vector<9x128xf32> to vector<1x128xf32>
    %122 = arith.maximumf %120, %121 : vector<1x128xf32>
    %123 = vector.extract_strided_slice %112 {offsets = [7, 0], sizes = [1, 128], strides = [1, 1]} : vector<9x128xf32> to vector<1x128xf32>
    %124 = vector.extract_strided_slice %112 {offsets = [8, 0], sizes = [1, 128], strides = [1, 1]} : vector<9x128xf32> to vector<1x128xf32>
    %125 = arith.maximumf %123, %124 : vector<1x128xf32>
    %126 = tpu.concatenate %113, %116, %119, %122, %125 in 0 : vector<1x128xf32>, vector<1x128xf32>, vector<1x128xf32>, vector<1x128xf32>, vector<1x128xf32> -> vector<5x128xf32>
    %127 = arith.truncf %126 : vector<5x128xf32> to vector<5x128xbf16>
    %cst_61 = arith.constant 0.000000e+00 : bf16
    %128 = vector.broadcast %cst_61 : bf16 to vector<3x128xbf16>
    %129 = tpu.concatenate %128, %127, %128 in 0 : vector<3x128xbf16>, vector<5x128xbf16>, vector<3x128xbf16> -> vector<11x128xbf16>
    %cst_62 = arith.constant 0.000000e+00 : f32
    %130 = vector.broadcast %cst_62 : f32 to vector<5x128xf32>
    %131 = vector.extract_strided_slice %129 {offsets = [0, 0], sizes = [5, 128], strides = [1, 1]} : vector<11x128xbf16> to vector<5x128xbf16>
    %c0_63 = arith.constant 0 : index
    %c0_64 = arith.constant 0 : index
    %c0_65 = arith.constant 0 : index
    %132 = vector.load %arg6[%c0_63, %c0_64, %c0_65] : memref<7x128x128xbf16, #tpu.memory_space<vmem>>, vector<1x128x128xbf16>
    %133 = vector.shape_cast %132 : vector<1x128x128xbf16> to vector<128x128xbf16>
    %cst_66 = arith.constant dense<0.000000e+00> : vector<5x128xf32>
    %134 = tpu.matmul %131, %133, %cst_66 {dimension_numbers = #tpu.dot_dimension_numbers<[1], [0], [0], [1], [0, 0, 1, 1], [], []>} : vector<5x128xbf16>, vector<128x128xbf16>, vector<5x128xf32> -> vector<5x128xf32>
    %135 = arith.addf %130, %134 : vector<5x128xf32>
    %136 = vector.extract_strided_slice %129 {offsets = [1, 0], sizes = [5, 128], strides = [1, 1]} : vector<11x128xbf16> to vector<5x128xbf16>
    %c1_67 = arith.constant 1 : index
    %c0_68 = arith.constant 0 : index
    %c0_69 = arith.constant 0 : index
    %137 = vector.load %arg6[%c1_67, %c0_68, %c0_69] : memref<7x128x128xbf16, #tpu.memory_space<vmem>>, vector<1x128x128xbf16>
    %138 = vector.shape_cast %137 : vector<1x128x128xbf16> to vector<128x128xbf16>
    %cst_70 = arith.constant dense<0.000000e+00> : vector<5x128xf32>
    %139 = tpu.matmul %136, %138, %cst_70 {dimension_numbers = #tpu.dot_dimension_numbers<[1], [0], [0], [1], [0, 0, 1, 1], [], []>} : vector<5x128xbf16>, vector<128x128xbf16>, vector<5x128xf32> -> vector<5x128xf32>
    %140 = arith.addf %135, %139 : vector<5x128xf32>
    %141 = vector.extract_strided_slice %129 {offsets = [2, 0], sizes = [5, 128], strides = [1, 1]} : vector<11x128xbf16> to vector<5x128xbf16>
    %c2_71 = arith.constant 2 : index
    %c0_72 = arith.constant 0 : index
    %c0_73 = arith.constant 0 : index
    %142 = vector.load %arg6[%c2_71, %c0_72, %c0_73] : memref<7x128x128xbf16, #tpu.memory_space<vmem>>, vector<1x128x128xbf16>
    %143 = vector.shape_cast %142 : vector<1x128x128xbf16> to vector<128x128xbf16>
    %cst_74 = arith.constant dense<0.000000e+00> : vector<5x128xf32>
    %144 = tpu.matmul %141, %143, %cst_74 {dimension_numbers = #tpu.dot_dimension_numbers<[1], [0], [0], [1], [0, 0, 1, 1], [], []>} : vector<5x128xbf16>, vector<128x128xbf16>, vector<5x128xf32> -> vector<5x128xf32>
    %145 = arith.addf %140, %144 : vector<5x128xf32>
    %146 = vector.extract_strided_slice %129 {offsets = [3, 0], sizes = [5, 128], strides = [1, 1]} : vector<11x128xbf16> to vector<5x128xbf16>
    %c3_75 = arith.constant 3 : index
    %c0_76 = arith.constant 0 : index
    %c0_77 = arith.constant 0 : index
    %147 = vector.load %arg6[%c3_75, %c0_76, %c0_77] : memref<7x128x128xbf16, #tpu.memory_space<vmem>>, vector<1x128x128xbf16>
    %148 = vector.shape_cast %147 : vector<1x128x128xbf16> to vector<128x128xbf16>
    %cst_78 = arith.constant dense<0.000000e+00> : vector<5x128xf32>
    %149 = tpu.matmul %146, %148, %cst_78 {dimension_numbers = #tpu.dot_dimension_numbers<[1], [0], [0], [1], [0, 0, 1, 1], [], []>} : vector<5x128xbf16>, vector<128x128xbf16>, vector<5x128xf32> -> vector<5x128xf32>
    %150 = arith.addf %145, %149 : vector<5x128xf32>
    %151 = vector.extract_strided_slice %129 {offsets = [4, 0], sizes = [5, 128], strides = [1, 1]} : vector<11x128xbf16> to vector<5x128xbf16>
    %c4_79 = arith.constant 4 : index
    %c0_80 = arith.constant 0 : index
    %c0_81 = arith.constant 0 : index
    %152 = vector.load %arg6[%c4_79, %c0_80, %c0_81] : memref<7x128x128xbf16, #tpu.memory_space<vmem>>, vector<1x128x128xbf16>
    %153 = vector.shape_cast %152 : vector<1x128x128xbf16> to vector<128x128xbf16>
    %cst_82 = arith.constant dense<0.000000e+00> : vector<5x128xf32>
    %154 = tpu.matmul %151, %153, %cst_82 {dimension_numbers = #tpu.dot_dimension_numbers<[1], [0], [0], [1], [0, 0, 1, 1], [], []>} : vector<5x128xbf16>, vector<128x128xbf16>, vector<5x128xf32> -> vector<5x128xf32>
    %155 = arith.addf %150, %154 : vector<5x128xf32>
    %156 = vector.extract_strided_slice %129 {offsets = [5, 0], sizes = [5, 128], strides = [1, 1]} : vector<11x128xbf16> to vector<5x128xbf16>
    %c5_83 = arith.constant 5 : index
    %c0_84 = arith.constant 0 : index
    %c0_85 = arith.constant 0 : index
    %157 = vector.load %arg6[%c5_83, %c0_84, %c0_85] : memref<7x128x128xbf16, #tpu.memory_space<vmem>>, vector<1x128x128xbf16>
    %158 = vector.shape_cast %157 : vector<1x128x128xbf16> to vector<128x128xbf16>
    %cst_86 = arith.constant dense<0.000000e+00> : vector<5x128xf32>
    %159 = tpu.matmul %156, %158, %cst_86 {dimension_numbers = #tpu.dot_dimension_numbers<[1], [0], [0], [1], [0, 0, 1, 1], [], []>} : vector<5x128xbf16>, vector<128x128xbf16>, vector<5x128xf32> -> vector<5x128xf32>
    %160 = arith.addf %155, %159 : vector<5x128xf32>
    %161 = vector.extract_strided_slice %129 {offsets = [6, 0], sizes = [5, 128], strides = [1, 1]} : vector<11x128xbf16> to vector<5x128xbf16>
    %c6_87 = arith.constant 6 : index
    %c0_88 = arith.constant 0 : index
    %c0_89 = arith.constant 0 : index
    %162 = vector.load %arg6[%c6_87, %c0_88, %c0_89] : memref<7x128x128xbf16, #tpu.memory_space<vmem>>, vector<1x128x128xbf16>
    %163 = vector.shape_cast %162 : vector<1x128x128xbf16> to vector<128x128xbf16>
    %cst_90 = arith.constant dense<0.000000e+00> : vector<5x128xf32>
    %164 = tpu.matmul %161, %163, %cst_90 {dimension_numbers = #tpu.dot_dimension_numbers<[1], [0], [0], [1], [0, 0, 1, 1], [], []>} : vector<5x128xbf16>, vector<128x128xbf16>, vector<5x128xf32> -> vector<5x128xf32>
    %165 = arith.addf %160, %164 : vector<5x128xf32>
    %c0_91 = arith.constant 0 : index
    %c0_92 = arith.constant 0 : index
    %166 = vector.load %arg7[%c0_91, %c0_92] : memref<1x128xf32, #tpu.memory_space<vmem>>, vector<1x128xf32>
    %167 = vector.broadcast %166 : vector<1x128xf32> to vector<5x128xf32>
    %168 = arith.addf %165, %167 : vector<5x128xf32>
    %cst_93 = arith.constant 0.000000e+00 : f32
    %169 = vector.broadcast %cst_93 : f32 to vector<5x128xf32>
    %170 = arith.maximumf %168, %169 : vector<5x128xf32>
    %171 = vector.extract_strided_slice %170 {offsets = [0, 0], sizes = [1, 128], strides = [1, 1]} : vector<5x128xf32> to vector<1x128xf32>
    %172 = vector.extract_strided_slice %170 {offsets = [1, 0], sizes = [1, 128], strides = [1, 1]} : vector<5x128xf32> to vector<1x128xf32>
    %173 = vector.extract_strided_slice %170 {offsets = [2, 0], sizes = [1, 128], strides = [1, 1]} : vector<5x128xf32> to vector<1x128xf32>
    %174 = arith.maximumf %172, %173 : vector<1x128xf32>
    %175 = vector.extract_strided_slice %170 {offsets = [3, 0], sizes = [1, 128], strides = [1, 1]} : vector<5x128xf32> to vector<1x128xf32>
    %176 = vector.extract_strided_slice %170 {offsets = [4, 0], sizes = [1, 128], strides = [1, 1]} : vector<5x128xf32> to vector<1x128xf32>
    %177 = arith.maximumf %175, %176 : vector<1x128xf32>
    %178 = tpu.concatenate %171, %174, %177 in 0 : vector<1x128xf32>, vector<1x128xf32>, vector<1x128xf32> -> vector<3x128xf32>
    %cst_94 = arith.constant dense<0.000000e+00> : vector<128xf32>
    %179 = vector.multi_reduction <add>, %178, %cst_94 [0] : vector<3x128xf32> to vector<128xf32>
    %180 = vector.shape_cast %179 : vector<128xf32> to vector<1x128xf32>
    %c0_95 = arith.constant 0 : index
    %c0_96 = arith.constant 0 : index
    %c0_97 = arith.constant 0 : index
    %181 = vector.load %arg8[%c0_95, %c0_96, %c0_97] : memref<1x1x128xf32, #tpu.memory_space<vmem>>, vector<1x1x128xf32>
    %182 = vector.shape_cast %181 : vector<1x1x128xf32> to vector<1x128xf32>
    %183 = vector.shape_cast %180 : vector<1x128xf32> to vector<1x1x128xf32>
    tpu.vector_store %arg8[%c0_95, %c0_96, %c0_97], %183 {strides = array<i32>} : memref<1x1x128xf32, #tpu.memory_space<vmem>>, vector<1x1x128xf32>,
    return
  }
  func.func @transform_0(%arg0: i32) -> (i32, i32, i32) {
    %c0_i32 = arith.constant 0 : i32
    %c0_i32_0 = arith.constant 0 : i32
    %c0_i32_1 = arith.constant 0 : i32
    return %arg0, %c0_i32, %c0_i32_0 : i32, i32, i32
  }
  func.func @transform_1(%arg0: i32) -> (i32, i32, i32) {
    %c0_i32 = arith.constant 0 : i32
    %c0_i32_0 = arith.constant 0 : i32
    %c0_i32_1 = arith.constant 0 : i32
    %c0_i32_2 = arith.constant 0 : i32
    return %c0_i32, %c0_i32_0, %c0_i32_1 : i32, i32, i32
  }
  func.func @transform_2(%arg0: i32) -> (i32, i32) {
    %c0_i32 = arith.constant 0 : i32
    %c0_i32_0 = arith.constant 0 : i32
    %c0_i32_1 = arith.constant 0 : i32
    return %c0_i32, %c0_i32_0 : i32, i32
  }
  func.func @transform_3(%arg0: i32) -> (i32, i32, i32) {
    %c0_i32 = arith.constant 0 : i32
    %c0_i32_0 = arith.constant 0 : i32
    %c0_i32_1 = arith.constant 0 : i32
    %c0_i32_2 = arith.constant 0 : i32
    return %c0_i32, %c0_i32_0, %c0_i32_1 : i32, i32, i32
  }
  func.func @transform_4(%arg0: i32) -> (i32, i32) {
    %c0_i32 = arith.constant 0 : i32
    %c0_i32_0 = arith.constant 0 : i32
    %c0_i32_1 = arith.constant 0 : i32
    return %c0_i32, %c0_i32_0 : i32, i32
  }
  func.func @transform_5(%arg0: i32) -> (i32, i32, i32) {
    %c0_i32 = arith.constant 0 : i32
    %c0_i32_0 = arith.constant 0 : i32
    %c0_i32_1 = arith.constant 0 : i32
    %c0_i32_2 = arith.constant 0 : i32
    return %c0_i32, %c0_i32_0, %c0_i32_1 : i32, i32, i32
  }
  func.func @transform_6(%arg0: i32) -> (i32, i32) {
    %c0_i32 = arith.constant 0 : i32
    %c0_i32_0 = arith.constant 0 : i32
    %c0_i32_1 = arith.constant 0 : i32
    return %c0_i32, %c0_i32_0 : i32, i32
  }
  func.func @transform_7(%arg0: i32) -> (i32, i32, i32) {
    %c0_i32 = arith.constant 0 : i32
    %c0_i32_0 = arith.constant 0 : i32
    %c0_i32_1 = arith.constant 0 : i32
    return %arg0, %c0_i32, %c0_i32_0 : i32, i32, i32
  }
}

</mosaic_0001>

<bundles_post_ra>
// kernel: tstcc_forward.3
= control target key start
LH: loop header
LB: loop body
LE: loop exit
PB: predicated region body
PF: predicated region fallthrough
CT: control target
= control target key end

     0   :  { %s463_s0 = inlined_call_operand.vmem [shape: f32[4,128], index: 0, kind: input, shape index: {}]   ;;  %s464_s1 = inlined_call_operand.vmem [shape: bf16[128,128], index: 1, kind: input, shape index: {}]   ;;  %s465_s2 = inlined_call_operand.vmem [shape: f32[1,128], index: 2, kind: input, shape index: {}]   ;;  %s466_s3 = inlined_call_operand.vmem [shape: bf16[128,128], index: 3, kind: input, shape index: {}]   ;;  %s467_s4 = inlined_call_operand.vmem [shape: f32[1,128], index: 4, kind: input, shape index: {}]   ;;  %s468_s5 = inlined_call_operand.vmem [shape: f32[4,128], index: 5, kind: output, shape index: {0}]   ;;  %s469_s6 = inlined_call_operand.hbm [shape: f32[2,2], index: 6, kind: output, shape index: {1}]  }
   0x1   :  { %v324_v0 = vld [vmem:[%s464_s1 + $0x38] sm:$0xff]  ;;  %v323_v1 = vld [vmem:[%s464_s1 + $0x30] sm:$0xff]  ;;  %v322_v4 = vld [vmem:[%s464_s1 + $0x28] sm:$0xff] }
   0x2   :  { %93 = vmatpush.bf16.msra.mxu0 %v324_v0  ;;  %v332_v2 = vld [vmem:[%s466_s3 + $0x38] sm:$0xff]  ;;  %v331_v3 = vld [vmem:[%s466_s3 + $0x30] sm:$0xff] }
   0x3   :  { %176 = vmatpush.bf16.msra.mxu1 %v332_v2 }
   0x6   :  { %94 = vmatpush.bf16.msra.mxu0 %v323_v1 }
   0x7   :  { %12 = vsyncpa [#allocation3], 0  ;;  %177 = vmatpush.bf16.msra.mxu1 %v331_v3  ;;  %v330_v5 = vld [vmem:[%s466_s3 + $0x28] sm:$0xff]  ;;  %v321_v6 = vld [vmem:[%s464_s1 + $0x20] sm:$0xff]  ;;  %vm191_vm0 = vcmask 1043456   ;;  %s242_s11 = sshll.u32 %s469_s6, 4  ;;  %s243_s11 = int_to_ptr.hbm [resolvable:$true] %s242_s11 }
   0x8   :  { %v329_v7 = vld [vmem:[%s466_s3 + $0x20] sm:$0xff]  ;;  %v320_v8 = vld [vmem:[%s464_s1 + $0x18] sm:$0xff]  ;;  %v319_v10 = vld [vmem:[%s464_s1 + $0x10] sm:$0xff]  ;;  %vm231_vm4 = vcmask 9216  }
   0x9   :  { %v328_v9 = vld [vmem:[%s466_s3 + $0x18] sm:$0xff]  ;;  %v327_v11 = vld [vmem:[%s466_s3 + $0x10] sm:$0xff]  ;;  %v318_v12 = vld [vmem:[%s464_s1 + $0x8] sm:$0xff] }
   0xa   :  { %95 = vmatpush.bf16.msra.mxu0 %v322_v4  ;;  %v317_v13 = vld [vmem:[%s464_s1] sm:$0xff]  ;;  %v326_v16 = vld [vmem:[%s466_s3 + $0x8] sm:$0xff] }
   0xb   :  { %178 = vmatpush.bf16.msra.mxu1 %v330_v5  ;;  %v23_v14 = vld [vmem:[%s463_s0] sm:$0xf] }
   0xc   :  { %v24_v15 = vpack.c.bf16 %v23_v14, %v23_v14  ;;  %v325_v17 = vld [vmem:[%s466_s3] sm:$0xff] }
   0xd   :  { %v334_v18 = vld [vmem:[%s465_s2] ss:$0 sm:$0xff]  ;;  %s364_s2 = smov [#allocation2]  }
   0xe   :  { %96 = vmatpush.bf16.msra.mxu0 %v321_v6  ;;  %v335_v24 = vld [vmem:[%s467_s4] ss:$0 sm:$0xff]  ;;  %s240_s4 = sshll.u32 %s364_s2, 4  ;;  %s241_s4 = int_to_ptr.vmem [resolvable:$true] %s240_s4 }
   0xf   :  { %179 = vmatpush.bf16.msra.mxu1 %v329_v7 }
  0x12   :  { %97 = vmatpush.bf16.msra.mxu0 %v320_v8 }
  0x13   :  { %180 = vmatpush.bf16.msra.mxu1 %v328_v9 }
  0x16   :  { %98 = vmatpush.bf16.msra.mxu0 %v319_v10 }
  0x17   :  { %181 = vmatpush.bf16.msra.mxu1 %v327_v11 }
  0x1a   :  { %99 = vmatpush.bf16.msra.mxu0 %v318_v12 }
  0x1b   :  { %182 = vmatpush.bf16.msra.mxu1 %v326_v16 }
  0x1e   :  { %100 = vmatpush.bf16.msra.mxu0 %v317_v13 }
  0x1f   :  { %183 = vmatpush.bf16.msra.mxu1 %v325_v17 }
  0x21   :  { %101 = vmatmul.bf16.vlgmr.msra.gmra.mxu0 %v24_v15 }
  0x9e   :  { %v102_v19 = vpop.f32.mrf.mxu0 }
  0x9f   :  { %v103_v20 = vadd.f32 %v334_v18, %v102_v19 }
  0xa1   :  { %v106_v21 = vmax.f32 %v103_v20, 0.0 }
  0xa3   :  { %v107_v22 = vpack.c.bf16 %v106_v21, %v106_v21 }
  0xa5   :  { %184 = vmatmul.bf16.vlgmr.msra.gmra.mxu1 %v107_v22 }
  0xa6   :  { %v104_v23 = vpop.f32.mrf.mxu0 }
 0x122   :  { %v185_v25 = vpop.f32.mrf.mxu1 }
 0x123   :  { %v186_v26 = vadd.f32 %v335_v24, %v185_v25 }
 0x125   :  { %189 = vst [vmem:[%s468_s5] sm:$0xf] %v186_v26  ;;  %v190_v27 = vmul.f32 %v186_v26, %v186_v26 }
 0x127   :  { %v192_v28 = vsel %vm191_vm0, %v190_v27, 0.0 }
 0x128   :  { %193 = vadd.xlane.f32.xlu0 %v192_v28 }
 0x12a   :  { %v187_v29 = vpop.f32.mrf.mxu1 }
 0x19b   :  { %v194_v30 = vpop.xlane.xlu0 %193 }
 0x19c   :  { %v195_v31 = vadd.f32 1e-12, %v194_v30 }
 0x19e   :  { %336 = vrsqrt.f32 %v195_v31  ;;  %vm202_vm2 = vweird.f32 %v195_v31 }
 0x1a4   :  { %v337_v32 = vpop.eup %336 }
 0x1a5   :  { %v197_v33 = vmul.f32 %v337_v32, %v195_v31  ;;  %vm203_vm1 = vweird.f32 %v337_v32 }
 0x1a6   :  { %vm204_vm3 = vmor %vm202_vm2, %vm203_vm1 }
 0x1a7   :  { %v198_v34 = vmul.f32 %v337_v32, %v197_v33 }
 0x1a9   :  { %v199_v35 = vmul.f32 0.5, %v198_v34 }
 0x1ab   :  { %v200_v36 = vsub.f32 1.5, %v199_v35 }
 0x1ad   :  { %v201_v37 = vmul.f32 %v337_v32, %v200_v36 }
 0x1af   :  { %v205_v38 = vsel %vm204_vm3, %v337_v32, %v201_v37 }
 0x1b0   :  { %v206_v39 = vmul.f32 %v205_v38, %v186_v26 }
 0x1b2   :  { %v208_v40 = vrot.slane %v206_v39, 2 }
 0x1b4   :  { %225 = vmatpush.xpose.msra.mxu2 %v208_v40 }
 0x1b7   :  { %226 = vmatmul.f32.vlgmr.msra.gmra.mxu2 %v206_v39 }
 0x23a   :  { %v227_v41 = vpop.f32.mrf.mxu2 }
 0x23b   :  { %v230_v42 = vmul.f32 5.0, %v227_v41 }
 0x23d   :  { %232 = vst.msk [vmem:[#allocation2] sm:$0x3] %vm231_vm4, %v230_v42 }
 0x23e   :  { %245 = dma.vmem_to_hbm [thread:$0]  %s241_s4, 32, %s243_s11, [#allocation3]  }
 0x23f   :  { %362 = dma.done.wait [#allocation3], 32  }
 0x240   :  { %363 = vsyncadd [#allocation3], 4294967264 }
 0x241   :  { %252 = vsyncpa [#allocation3], 1 }

// kernel: tstcc_forward.2
= control target key start
LH: loop header
LB: loop body
LE: loop exit
PB: predicated region body
PF: predicated region fallthrough
CT: control target
= control target key end

     0   :  { %12 = vsyncpa [#allocation3], 0  ;;  %s3519_s0 = inlined_call_operand.vmem [shape: bf16[4,16,128], index: 0, kind: input, shape index: {}]   ;;  %s3520_s1 = inlined_call_operand.hbm [shape: bf16[7,128,128], index: 1, kind: input, shape index: {}]   ;;  %s3521_s2 = inlined_call_operand.vmem [shape: f32[1,128], index: 2, kind: input, shape index: {}]   ;;  %s3522_s3 = inlined_call_operand.hbm [shape: bf16[7,128,128], index: 3, kind: input, shape index: {}]   ;;  %s3523_s4 = inlined_call_operand.vmem [shape: f32[1,128], index: 4, kind: input, shape index: {}]   ;;  %s3524_s5 = inlined_call_operand.hbm [shape: bf16[7,128,128], index: 5, kind: input, shape index: {}]   ;;  %s3525_s6 = inlined_call_operand.vmem [shape: f32[1,128], index: 6, kind: input, shape index: {}]   ;;  %s3526_s7 = inlined_call_operand.vmem [shape: f32[4,1,128], index: 7, kind: output, shape index: {}]  }
   0x1   :  { %13 = vsyncpa [#allocation5], 0  ;;  %s3389_s24 = smov 0  }
   0x2 LB: > { %s3395_s25 = sadd.s32 4294967295, %s3342_s24   ;;  %p2333_p0 = scmp.ge.s32.totalorder %s3342_s24, 1  ;;  %s3342_s24 = sphi %s3389_s24, %s19_s24  }
   0x3   : > { %p202_p1 = scmp.lt.s32.totalorder %s3342_s24, 5  ;;  %p3216_p2 = scmp.eq.s32.totalorder %s3395_s25, 0 }
   0x4   : > { %s230_s28 = sshll.u32 %s3522_s3, 4  ;;  %s213_s9 = sshll.u32 %s3520_s1, 4  ;;  %s231_s28 = int_to_ptr.hbm [resolvable:$true] %s230_s28  ;;  %s214_s9 = int_to_ptr.hbm [resolvable:$true] %s213_s9 }
   0x5   : > { %p3403_p3 = pnand %p2333_p0, %p202_p1  ;;  %s3344_s10 = smov [#allocation4]  }
   0x6   : > { %s232_s11 = sshll.u32 %s3344_s10, 4  ;;  %s3345_s12 = smov [#allocation2]   ;;  %s233_s11 = int_to_ptr.vmem [resolvable:$true] %s232_s11 }
   0x7   : > { %p3206_p4 = pneg %p3403_p3  ;;  %s215_s13 = sshll.u32 %s3345_s12, 4  ;;  %s216_s13 = int_to_ptr.vmem [resolvable:$true] %s215_s13 }
   0x8   : > { %s247_s16 = sshll.u32 %s3524_s5, 4  ;;  %s3346_s17 = smov 64   ;;  %s248_s16 = int_to_ptr.hbm [resolvable:$true] %s247_s16 }
   0x9   : > { %p3207_p5 = pnand %p3216_p2, %p3206_p4  ;;  %s3347_s18 = smov 4  }
   0xa   : > { %s3348_s19 = smov [#allocation6]   ;;  %276 = sbr.rel (%p3403_p3) target bundleno = 632 (0x278), region = 48 }
   0xb   : > { %3212 = dma.hbm_to_vmem [thread:$0]  (!%p3207_p5), %s231_s28, 7168, %s233_s11, [#allocation5], %s3346_s17, %s3346_s17, %s3347_s18  }
   0xc   : > { %3209 = dma.hbm_to_vmem [thread:$0]  (!%p3207_p5), %s214_s9, 7168, %s216_s13, [#allocation3], %s3346_s17, %s3346_s17, %s3347_s18  }
   0xd   : > { %s249_s20 = sshll.u32 %s3348_s19, 4  ;;  %s250_s20 = int_to_ptr.vmem [resolvable:$true] %s249_s20 }
   0xe   : > { %3215 = dma.hbm_to_vmem [thread:$0]  (!%p3207_p5), %s248_s16, 7168, %s250_s20, [#allocation5], %s3346_s17, %s3346_s17, %s3347_s18  }
   0xf   : > { %3333 = dma.done.wait (%p3216_p2), [#allocation3], 7168  }
  0x10   : > { %3335 = vsyncadd (%p3216_p2), [#allocation3], 4294960128 }
  0x11   : > { %3337 = dma.done.wait (%p3216_p2), [#allocation5], 14336  }
  0x12   : > { %3339 = vsyncadd (%p3216_p2), [#allocation5], 4294952960  ;;  %p317_p6 = scmp.lt.s32.totalorder %s3395_s25, 3  ;;  %v3041_v0 = vld [vmem:[#allocation2 + $0x78] sm:$0xff]  ;;  %v3040_v3 = vld [vmem:[#allocation2 + $0x70] sm:$0xff]  ;;  %vm342_vm0 = vcmask 1041408  }
  0x13   : > { %v3033_v1 = vld [vmem:[#allocation2 + $0x38] sm:$0xff]  ;;  %442 = vmatpush.bf16.msra.mxu0 %v3041_v0  ;;  %v3032_v4 = vld [vmem:[#allocation2 + $0x30] sm:$0xff]  ;;  %v3039_v8 = vld [vmem:[#allocation2 + $0x68] sm:$0xff]  ;;  %vm343_vm1 = vsmask.f32 1280  ;;  %vm537_vm4 = vcmask 1046528  }
  0x14   : > { %v3049_v2 = vld [vmem:[#allocation2 + $0xb8] sm:$0xff]  ;;  %504 = vmatpush.bf16.msra.mxu1 %v3033_v1  ;;  %s3531_s25 = smov (!%p317_p6, %s3395_s25), 3  ;;  %v3048_v6 = vld [vmem:[#allocation2 + $0xb0] sm:$0xff]  ;;  %v3031_v9 = vld [vmem:[#allocation2 + $0x28] sm:$0xff]  ;;  %vm380_vm3 = vsmask.f32 7424 }
  0x15   : > { %v3057_v5 = vld [vmem:[#allocation2 + $0xf8] sm:$0xff]  ;;  %590 = vmatpush.bf16.msra.mxu2 %v3049_v2  ;;  %v3056_v7 = vld [vmem:[#allocation2 + $0xf0] sm:$0xff]  ;;  %s3024_s21 = sshll.u32 %s3531_s25, 3  ;;  %v3047_v10 = vld [vmem:[#allocation2 + $0xa8] sm:$0xff]  ;;  %vm623_vm5 = vsmask.f32 6400  ;;  %s324_s12 = scalar_lea.vmem %s3526_s7, %s3531_s25 }
  0x16   : > { %682 = vmatpush.bf16.msra.mxu3 %v3057_v5  ;;  %v3055_v11 = vld [vmem:[#allocation2 + $0xe8] sm:$0xff]  ;;  %s321_s26 = scalar_lea.vmem %s3519_s0, %s3024_s21  ;;  %v3038_v12 = vld [vmem:[#allocation2 + $0x60] sm:$0xff]  ;;  %v3037_v17 = vld [vmem:[#allocation2 + $0x58] sm:$0xff]  ;;  %vm715_vm6 = vcmask 1045504   ;;  %vm801_vm7 = vsmask.f32 5376 }
  0x17   : > { %443 = vmatpush.bf16.msra.mxu0 %v3040_v3  ;;  %v3030_v13 = vld [vmem:[#allocation2 + $0x20] sm:$0xff]  ;;  %v3029_v18 = vld [vmem:[#allocation2 + $0x18] sm:$0xff]  ;;  %vm3436_vm2 = vmand %vm342_vm0, %vm343_vm1  ;;  %vm891_vm8 = vcmask 1044480   ;;  %vm994_vm9 = vcmask 1040384   ;;  %vm998_vm10 = vcmask 1042432   ;;  %vm1000_vm11 = vcmask 1043456  }
  0x18   : > { %505 = vmatpush.bf16.msra.mxu1 %v3032_v4  ;;  %v3046_v14 = vld [vmem:[#allocation2 + $0xa0] sm:$0xff]  ;;  %v3045_v21 = vld [vmem:[#allocation2 + $0x98] sm:$0xff]  ;;  %v3036_v26 = vld [vmem:[#allocation2 + $0x50] sm:$0xff] }
  0x19   : > { %591 = vmatpush.bf16.msra.mxu2 %v3048_v6  ;;  %v3054_v15 = vld [vmem:[#allocation2 + $0xe0] sm:$0xff]  ;;  %v3053_v22 = vld [vmem:[#allocation2 + $0xd8] sm:$0xff]  ;;  %v3028_v27 = vld [vmem:[#allocation2 + $0x10] sm:$0xff] }
  0x1a   : > { %683 = vmatpush.bf16.msra.mxu3 %v3056_v7  ;;  %v3025_v16 = vld [vmem:[%s321_s26] sm:$0xff]  ;;  %v3044_v29 = vld [vmem:[#allocation2 + $0x90] sm:$0xff]  ;;  %v3035_v35 = vld [vmem:[#allocation2 + $0x48] sm:$0xff] }
  0x1b   : > { %444 = vmatpush.bf16.msra.mxu0 %v3039_v8  ;;  %v334_v19 = vshrl.u32 %v3025_v16, 16  ;;  %v337_v20 = vshll.u32 %v3025_v16, 16  ;;  %v3052_v30 = vld [vmem:[#allocation2 + $0xd0] sm:$0xff]  ;;  %v3027_v36 = vld [vmem:[#allocation2 + $0x8] sm:$0xff]  ;;  %v3034_v44 = vld [vmem:[#allocation2 + $0x40] sm:$0xff] }
  0x1c   : > { %506 = vmatpush.bf16.msra.mxu1 %v3031_v9  ;;  %v3043_v39 = vld [vmem:[#allocation2 + $0x88] sm:$0xff]  ;;  %v3026_v45 = vld [vmem:[#allocation2] sm:$0xff]  ;;  %v3065_v51 = vld [vmem:[#allocation2 + $0x138] sm:$0xff] }
  0x1d   : > { %592 = vmatpush.bf16.msra.mxu2 %v3047_v10  ;;  %v336_v23 = vrot.slane %v334_v19, 6  ;;  %v339_v24 = vrot.slane %v337_v20, 7  ;;  %v3051_v41 = vld [vmem:[#allocation2 + $0xc8] sm:$0xff]  ;;  %v3042_v50 = vld [vmem:[#allocation2 + $0x80] sm:$0xff]  ;;  %v3073_v54 = vld [vmem:[#allocation2 + $0x178] sm:$0xff] }
  0x1e   : > { %684 = vmatpush.bf16.msra.mxu3 %v3055_v11  ;;  %v3081_v55 = vld [vmem:[#allocation2 + $0x1b8] sm:$0xff]  ;;  %v3050_v56 = vld [vmem:[#allocation2 + $0xc0] sm:$0xff]  ;;  %v3064_v60 = vld [vmem:[#allocation2 + $0x130] sm:$0xff] }
  0x1f   : > { %445 = vmatpush.bf16.msra.mxu0 %v3038_v12  ;;  %v340_v28 = vor.u32 %v339_v24, %v336_v23  ;;  %v3072_v62 = vld [vmem:[#allocation2 + $0x170] sm:$0xff]  ;;  %v3063_v1 = vld [vmem:[#allocation2 + $0x128] sm:$0xff]  ;;  %v3062_v4 = vld [vmem:[#allocation2 + $0x120] sm:$0xff] }
  0x20   : > { %507 = vmatpush.bf16.msra.mxu1 %v3030_v13  ;;  %v3080_v63 = vld [vmem:[#allocation2 + $0x1b0] sm:$0xff]  ;;  %v3071_v2 = vld [vmem:[#allocation2 + $0x168] sm:$0xff]  ;;  %v3070_v5 = vld [vmem:[#allocation2 + $0x160] sm:$0xff] }
  0x21   : > { %593 = vmatpush.bf16.msra.mxu2 %v3046_v14  ;;  %v3442_v31 = vsel %vm3436_vm2, 0, %v340_v28  ;;  %v3446_v32 = vsel %vm3436_vm2, %v340_v28, 0  ;;  %v3079_v3 = vld [vmem:[#allocation2 + $0x1a8] sm:$0xff]  ;;  %v3078_v6 = vld [vmem:[#allocation2 + $0x1a0] sm:$0xff]  ;;  %v3061_v7 = vld [vmem:[#allocation2 + $0x118] sm:$0xff] }
  0x22   : > { %685 = vmatpush.bf16.msra.mxu3 %v3054_v15  ;;  %v3449_v33 = vshrl.u32 %v3442_v31, 16  ;;  %v3452_v34 = vshll.u32 %v3442_v31, 16  ;;  %v3455_v37 = vshll.u32 %v3446_v32, 16  ;;  %v627_v38 = vshrl.u32 %v3446_v32, 16  ;;  %v3069_v8 = vld [vmem:[#allocation2 + $0x158] sm:$0xff]  ;;  %v3060_v10 = vld [vmem:[#allocation2 + $0x110] sm:$0xff] }
  0x23   : > { %446 = vmatpush.bf16.msra.mxu0 %v3037_v17  ;;  %v538_v52 = vrot.slane %v3442_v31, 1  ;;  %v539_v53 = vrot.slane %v3446_v32, 1  ;;  %v3077_v9 = vld [vmem:[#allocation2 + $0x198] sm:$0xff]  ;;  %v3068_v11 = vld [vmem:[#allocation2 + $0x150] sm:$0xff]  ;;  %v3059_v13 = vld [vmem:[#allocation2 + $0x108] sm:$0xff]  ;;  %v892_v28 = vrot.slane %v3442_v31, 3 }
  0x24   : > { %508 = vmatpush.bf16.msra.mxu1 %v3029_v18  ;;  %v386_v40 = vrot.slane %v3452_v34, 1  ;;  %v624_v42 = vrot.slane %v3449_v33, 1  ;;  %v625_v43 = vrot.slane %v3452_v34, 2  ;;  %v629_v46 = vrot.slane %v627_v38, 1  ;;  %v3076_v12 = vld [vmem:[#allocation2 + $0x190] sm:$0xff]  ;;  %v3067_v14 = vld [vmem:[#allocation2 + $0x148] sm:$0xff] }
  0x25   : > { %594 = vmatpush.bf16.msra.mxu2 %v3045_v21  ;;  %v630_v47 = vrot.slane %v3455_v37, 2  ;;  %v391_v49 = vrot.slane %v3455_v37, 1  ;;  %v540_v61 = vsel %vm537_vm4, %v538_v52, %v539_v53  ;;  %v3075_v15 = vld [vmem:[#allocation2 + $0x188] sm:$0xff]  ;;  %v802_v16 = vrot.slane %v3449_v33, 2  ;;  %v3058_v20 = vld [vmem:[#allocation2 + $0x100] sm:$0xff]  ;;  %v3093_v52 = vld [vmem:[#allocation4 + $0x58] sm:$0xff] }
  0x26   : > { %686 = vmatpush.bf16.msra.mxu3 %v3053_v22  ;;  %v387_v48 = vor.u32 %v386_v40, %v3449_v33  ;;  %v626_v57 = vor.u32 %v625_v43, %v624_v42  ;;  %v803_v17 = vrot.slane %v3452_v34, 3  ;;  %v805_v18 = vrot.slane %v627_v38, 2  ;;  %v3066_v23 = vld [vmem:[#allocation2 + $0x140] sm:$0xff]  ;;  %v3087_v38 = vld [vmem:[#allocation4 + $0x28] sm:$0xff]  ;;  %v3100_v53 = vld [vmem:[#allocation4 + $0x90] sm:$0xff] }
  0x27   : > { %447 = vmatpush.bf16.msra.mxu0 %v3036_v26  ;;  %v631_v58 = vor.u32 %v630_v47, %v629_v46  ;;  %v806_v19 = vrot.slane %v3455_v37, 3  ;;  %v716_v21 = vrot.slane %v3442_v31, 2  ;;  %v717_v22 = vrot.slane %v3446_v32, 2  ;;  %v3074_v24 = vld [vmem:[#allocation2 + $0x180] sm:$0xff]  ;;  %v3088_v37 = vld [vmem:[#allocation4 + $0x30] sm:$0xff]  ;;  %v3103_v40 = vld [vmem:[#allocation4 + $0xa8] sm:$0xff] }
  0x28   : > { %509 = vmatpush.bf16.msra.mxu1 %v3028_v27  ;;  %v392_v59 = vsel %vm380_vm3, %v387_v48, %v391_v49  ;;  %v804_v26 = vor.u32 %v803_v17, %v802_v16  ;;  %v3095_v43 = vld [vmem:[#allocation4 + $0x68] sm:$0xff]  ;;  %v3094_v47 = vld [vmem:[#allocation4 + $0x60] sm:$0xff]  ;;  %v3101_v48 = vld [vmem:[#allocation4 + $0x98] sm:$0xff] }
  0x29   : > { %595 = vmatpush.bf16.msra.mxu2 %v3044_v29  ;;  %v632_v0 = vsel %vm623_vm5, %v626_v57, %v631_v58  ;;  %v807_v27 = vor.u32 %v806_v19, %v805_v18  ;;  %v893_v29 = vrot.slane %v3446_v32, 3  ;;  %v3104_v32 = vld [vmem:[#allocation4 + $0xb0] sm:$0xff]  ;;  %v3121_v16 = vld [vmem:[#allocation4 + $0x138] sm:$0xff]  ;;  %v3127_v19 = vld [vmem:[#allocation4 + $0x168] sm:$0xff] }
  0x2a   : > { %687 = vmatpush.bf16.msra.mxu3 %v3052_v30  ;;  %v718_v30 = vsel %vm715_vm6, %v716_v21, %v717_v22  ;;  %v3084_v49 = vld [vmem:[#allocation4 + $0x10] sm:$0xff]  ;;  %v3235_v21 = vld [vmem:[%s3521_s2] ss:$0 sm:$0xff] }
  0x2b   : > { %448 = vmatpush.bf16.msra.mxu0 %v3035_v35  ;;  %v808_v33 = vsel %vm801_vm7, %v804_v26, %v807_v27  ;;  %v894_v34 = vsel %vm891_vm8, %v892_v28, %v893_v29  ;;  %v3089_v35 = vld [vmem:[#allocation4 + $0x38] sm:$0xff]  ;;  %v3112_v57 = vld [vmem:[#allocation4 + $0xf0] sm:$0xff]  ;;  %v3135_v26 = vld [vmem:[#allocation4 + $0x1a8] sm:$0xff] }
  0x2c   : > { %510 = vmatpush.bf16.msra.mxu1 %v3027_v36  ;;  %v3105_v36 = vld [vmem:[#allocation4 + $0xb8] sm:$0xff]  ;;  %v3136_v17 = vld [vmem:[#allocation4 + $0x1b0] sm:$0xff]  ;;  %v3126_v27 = vld [vmem:[#allocation4 + $0x160] sm:$0xff] }
  0x2d   : > { %596 = vmatpush.bf16.msra.mxu2 %v3043_v39  ;;  %v3096_v39 = vld [vmem:[#allocation4 + $0x70] sm:$0xff] }
  0x2e   : > { %688 = vmatpush.bf16.msra.mxu3 %v3051_v41  ;;  %v3086_v41 = vld [vmem:[#allocation4 + $0x20] sm:$0xff]  ;;  %v3108_v22 = vld [vmem:[#allocation4 + $0xd0] sm:$0xff] }
  0x2f   : > { %449 = vmatpush.bf16.msra.mxu0 %v3034_v44  ;;  %v3102_v44 = vld [vmem:[#allocation4 + $0xa0] sm:$0xff] }
  0x30   : > { %511 = vmatpush.bf16.msra.mxu1 %v3026_v45  ;;  %v3085_v45 = vld [vmem:[#allocation4 + $0x18] sm:$0xff] }
  0x31   : > { %597 = vmatpush.bf16.msra.mxu2 %v3042_v50  ;;  %v3113_v50 = vld [vmem:[#allocation4 + $0xf8] sm:$0xff] }
  0x32   : > { %689 = vmatpush.bf16.msra.mxu3 %v3050_v56  ;;  %450 = vmatmul.bf16.vlgmr.msra.gmra.mxu0 %v392_v59  ;;  %v3083_v56 = vld [vmem:[#allocation4 + $0x8] sm:$0xff] }
  0x33   : > { %768 = vmatpush.bf16.msrb.mxu0 %v3065_v51  ;;  %512 = vmatmul.bf16.vlgmr.msra.gmra.mxu1 %v3442_v31  ;;  %v3097_v31 = vld [vmem:[#allocation4 + $0x78] sm:$0xff] }
  0x34   : > { %858 = vmatpush.bf16.msrb.mxu1 %v3073_v54  ;;  %598 = vmatmul.bf16.vlgmr.msra.gmra.mxu2 %v540_v61  ;;  %v3099_v61 = vld [vmem:[#allocation4 + $0x88] sm:$0xff] }
  0x35   : > { %944 = vmatpush.bf16.msrb.mxu2 %v3081_v55  ;;  %690 = vmatmul.bf16.vlgmr.msra.gmra.mxu3 %v632_v0  ;;  %v3111_v0 = vld [vmem:[#allocation4 + $0xe8] sm:$0xff] }
  0x36   : > { %1117 = vmatpush.bf16.msrb.mxu3 %v3097_v31  ;;  %v3134_v31 = vld [vmem:[#allocation4 + $0x1a0] sm:$0xff] }
  0x37   : > { %769 = vmatpush.bf16.msrb.mxu0 %v3064_v60  ;;  %v3092_v60 = vld [vmem:[#allocation4 + $0x50] sm:$0xff] }
  0x38   : > { %859 = vmatpush.bf16.msrb.mxu1 %v3072_v62 }
  0x39   : > { %945 = vmatpush.bf16.msrb.mxu2 %v3080_v63  ;;  %v3082_v63 = vld [vmem:[#allocation4] sm:$0xff] }
  0x3a   : > { %1118 = vmatpush.bf16.msrb.mxu3 %v3096_v39 }
  0x3b   : > { %770 = vmatpush.bf16.msrb.mxu0 %v3063_v1  ;;  %v3129_v1 = vld [vmem:[#allocation4 + $0x178] sm:$0xff] }
  0x3c   : > { %860 = vmatpush.bf16.msrb.mxu1 %v3071_v2 }
  0x3d   : > { %946 = vmatpush.bf16.msrb.mxu2 %v3079_v3  ;;  %v3091_v3 = vld [vmem:[#allocation4 + $0x48] sm:$0xff] }
  0x3e   : > { %1119 = vmatpush.bf16.msrb.mxu3 %v3095_v43 }
  0x3f   : > { %771 = vmatpush.bf16.msrb.mxu0 %v3062_v4  ;;  %v3098_v4 = vld [vmem:[#allocation4 + $0x80] sm:$0xff] }
  0x40   : > { %861 = vmatpush.bf16.msrb.mxu1 %v3070_v5 }
  0x41   : > { %947 = vmatpush.bf16.msrb.mxu2 %v3078_v6 }
  0x42   : > { %1120 = vmatpush.bf16.msrb.mxu3 %v3094_v47  ;;  %v3124_v47 = vld [vmem:[#allocation4 + $0x150] sm:$0xff] }
  0x43   : > { %772 = vmatpush.bf16.msrb.mxu0 %v3061_v7 }
  0x44   : > { %862 = vmatpush.bf16.msrb.mxu1 %v3069_v8  ;;  %v3110_v8 = vld [vmem:[#allocation4 + $0xe0] sm:$0xff] }
  0x45   : > { %948 = vmatpush.bf16.msrb.mxu2 %v3077_v9  ;;  %v3137_v9 = vld [vmem:[#allocation4 + $0x1b8] sm:$0xff] }
  0x46   : > { %1121 = vmatpush.bf16.msrb.mxu3 %v3093_v52  ;;  %v3132_v52 = vld [vmem:[#allocation4 + $0x190] sm:$0xff] }
  0x47   : > { %773 = vmatpush.bf16.msrb.mxu0 %v3060_v10  ;;  %v3128_v10 = vld [vmem:[#allocation4 + $0x170] sm:$0xff] }
  0x48   : > { %863 = vmatpush.bf16.msrb.mxu1 %v3068_v11 }
  0x49   : > { %949 = vmatpush.bf16.msrb.mxu2 %v3076_v12 }
  0x4a   : > { %1122 = vmatpush.bf16.msrb.mxu3 %v3092_v60 }
  0x4b   : > { %774 = vmatpush.bf16.msrb.mxu0 %v3059_v13  ;;  %v3090_v13 = vld [vmem:[#allocation4 + $0x40] sm:$0xff] }
  0x4c   : > { %864 = vmatpush.bf16.msrb.mxu1 %v3067_v14 }
  0x4d   : > { %950 = vmatpush.bf16.msrb.mxu2 %v3075_v15  ;;  %v3109_v15 = vld [vmem:[#allocation4 + $0xd8] sm:$0xff] }
  0x4e   : > { %1123 = vmatpush.bf16.msrb.mxu3 %v3091_v3 }
  0x4f   : > { %775 = vmatpush.bf16.msrb.mxu0 %v3058_v20 }
  0x50   : > { %865 = vmatpush.bf16.msrb.mxu1 %v3066_v23  ;;  %v3120_v23 = vld [vmem:[#allocation4 + $0x130] sm:$0xff] }
  0x51   : > { %951 = vmatpush.bf16.msrb.mxu2 %v3074_v24 }
  0x52   : > { %776 = vmatmul.bf16.vlgmr.msrb.gmra.mxu0 %v718_v30  ;;  %1124 = vmatpush.bf16.msrb.mxu3 %v3090_v13  ;;  %v3114_v13 = vld [vmem:[#allocation4 + $0x100] sm:$0xff] }
  0x53   : > { %866 = vmatmul.bf16.vlgmr.msrb.gmra.mxu1 %v808_v33  ;;  %1179 = vmatpush.bf16.msra.mxu0 %v3089_v35 }
  0x54   : > { %952 = vmatmul.bf16.vlgmr.msrb.gmra.mxu2 %v894_v34  ;;  %1261 = vmatpush.bf16.msra.mxu1 %v3105_v36  ;;  %v3107_v36 = vld [vmem:[#allocation4 + $0xc8] sm:$0xff] }
  0x55   : > { %1346 = vmatpush.bf16.msra.mxu2 %v3113_v50 }
  0x56   : > { %1429 = vmatpush.bf16.msra.mxu3 %v3121_v16 }
  0x57   : > { %1180 = vmatpush.bf16.msra.mxu0 %v3088_v37  ;;  %v3119_v37 = vld [vmem:[#allocation4 + $0x128] sm:$0xff] }
  0x58   : > { %1262 = vmatpush.bf16.msra.mxu1 %v3104_v32 }
  0x59   : > { %1347 = vmatpush.bf16.msra.mxu2 %v3112_v57 }
  0x5a   : > { %1430 = vmatpush.bf16.msra.mxu3 %v3120_v23 }
  0x5b   : > { %1181 = vmatpush.bf16.msra.mxu0 %v3087_v38  ;;  %v3125_v38 = vld [vmem:[#allocation4 + $0x158] sm:$0xff] }
  0x5c   : > { %1263 = vmatpush.bf16.msra.mxu1 %v3103_v40 }
  0x5d   : > { %1348 = vmatpush.bf16.msra.mxu2 %v3111_v0 }
  0x5e   : > { %1431 = vmatpush.bf16.msra.mxu3 %v3119_v37 }
  0x5f   : > { %1182 = vmatpush.bf16.msra.mxu0 %v3086_v41 }
  0x60   : > { %1264 = vmatpush.bf16.msra.mxu1 %v3102_v44  ;;  %v3106_v44 = vld [vmem:[#allocation4 + $0xc0] sm:$0xff] }
  0x61   : > { %1349 = vmatpush.bf16.msra.mxu2 %v3110_v8 }
  0x63   : > { %1183 = vmatpush.bf16.msra.mxu0 %v3085_v45  ;;  %v3118_v45 = vld [vmem:[#allocation4 + $0x120] sm:$0xff] }
  0x64   : > { %1265 = vmatpush.bf16.msra.mxu1 %v3101_v48  ;;  %1432 = vmatpush.bf16.msra.mxu3 %v3118_v45  ;;  %v3159_v45 = vld [vmem:[#allocation6 + $0xa8] sm:$0xff] }
  0x65   : > { %1350 = vmatpush.bf16.msra.mxu2 %v3109_v15 }
  0x67   : > { %1184 = vmatpush.bf16.msra.mxu0 %v3084_v49 }
  0x68   : > { %1266 = vmatpush.bf16.msra.mxu1 %v3100_v53  ;;  %v3123_v53 = vld [vmem:[#allocation4 + $0x148] sm:$0xff] }
  0x69   : > { %1351 = vmatpush.bf16.msra.mxu2 %v3108_v22 }
  0x6b   : > { %1185 = vmatpush.bf16.msra.mxu0 %v3083_v56  ;;  %v3116_v56 = vld [vmem:[#allocation4 + $0x110] sm:$0xff] }
  0x6c   : > { %1267 = vmatpush.bf16.msra.mxu1 %v3099_v61 }
  0x6d   : > { %1352 = vmatpush.bf16.msra.mxu2 %v3107_v36 }
  0x6f   : > { %1186 = vmatpush.bf16.msra.mxu0 %v3082_v63 }
  0x70   : > { %1268 = vmatpush.bf16.msra.mxu1 %v3098_v4 }
  0x71   : > { %1353 = vmatpush.bf16.msra.mxu2 %v3106_v44  ;;  %v3152_v44 = vld [vmem:[#allocation6 + $0x70] sm:$0xff] }
  0x73   : > { %1514 = vmatpush.bf16.msrb.mxu0 %v3129_v1 }
  0x74   : > { %1597 = vmatpush.bf16.msrb.mxu1 %v3137_v9 }
  0x77   : > { %1515 = vmatpush.bf16.msrb.mxu0 %v3128_v10 }
  0x78   : > { %1598 = vmatpush.bf16.msrb.mxu1 %v3136_v17 }
  0x7b   : > { %1516 = vmatpush.bf16.msrb.mxu0 %v3127_v19 }
  0x7c   : > { %1599 = vmatpush.bf16.msrb.mxu1 %v3135_v26 }
  0x7f   : > { %1517 = vmatpush.bf16.msrb.mxu0 %v3126_v27 }
  0x80   : > { %1600 = vmatpush.bf16.msrb.mxu1 %v3134_v31 }
  0x83   : > { %1518 = vmatpush.bf16.msrb.mxu0 %v3125_v38  ;;  %v3145_v38 = vld [vmem:[#allocation6 + $0x38] sm:$0xff] }
  0x87   : > { %1519 = vmatpush.bf16.msrb.mxu0 %v3124_v47  ;;  %v3151_v47 = vld [vmem:[#allocation6 + $0x68] sm:$0xff] }
  0x8b   : > { %1520 = vmatpush.bf16.msrb.mxu0 %v3123_v53 }
  0xaf   : > { %v451_v42 = vpop.f32.mrf.mxu0 }
  0xb0   : > { %v513_v46 = vpop.f32.mrf.mxu1 }
  0xb1   : > { %v514_v54 = vadd.f32 %v513_v46, %v451_v42  ;;  %v3133_v46 = vld [vmem:[#allocation4 + $0x198] sm:$0xff] }
  0xb2   : > { %1601 = vmatpush.bf16.msrb.mxu1 %v3133_v46  ;;  %v3142_v46 = vld [vmem:[#allocation6 + $0x20] sm:$0xff] }
  0xb6   : > { %1602 = vmatpush.bf16.msrb.mxu1 %v3132_v52  ;;  %v3157_v52 = vld [vmem:[#allocation6 + $0x98] sm:$0xff] }
  0xb7   : > { %v599_v51 = vpop.f32.mrf.mxu2  ;;  %v453_v55 = vpop.f32.mrf.mxu0 }
  0xb8   : > { %v691_v58 = vpop.f32.mrf.mxu3  ;;  %v515_v59 = vpop.f32.mrf.mxu1  ;;  %v604_v62 = vadd.f32 %v599_v51, %v514_v54  ;;  %v3117_v51 = vld [vmem:[#allocation4 + $0x118] sm:$0xff] }
  0xb9   : > { %v516_v6 = vadd.f32 %v515_v59, %v453_v55  ;;  %1433 = vmatpush.bf16.msra.mxu3 %v3117_v51  ;;  %v3122_v59 = vld [vmem:[#allocation4 + $0x140] sm:$0xff] }
  0xba   : > { %v696_v5 = vadd.f32 %v691_v58, %v604_v62  ;;  %v3131_v58 = vld [vmem:[#allocation4 + $0x188] sm:$0xff]  ;;  %1521 = vmatpush.bf16.msrb.mxu0 %v3122_v59  ;;  %v3150_v51 = vld [vmem:[#allocation6 + $0x60] sm:$0xff] }
  0xbb   : > { %1603 = vmatpush.bf16.msrb.mxu1 %v3131_v58  ;;  %v3156_v58 = vld [vmem:[#allocation6 + $0x90] sm:$0xff]  ;;  %v3139_v59 = vld [vmem:[#allocation6 + $0x8] sm:$0xff] }
  0xbd   : > { %1434 = vmatpush.bf16.msra.mxu3 %v3116_v56 }
  0xbf   : > { %v601_v2 = vpop.f32.mrf.mxu2 }
  0xc0   : > { %v605_v14 = vadd.f32 %v601_v2, %v516_v6  ;;  %v693_v18 = vpop.f32.mrf.mxu3  ;;  %v3115_v2 = vld [vmem:[#allocation4 + $0x108] sm:$0xff]  ;;  %v3130_v6 = vld [vmem:[#allocation4 + $0x180] sm:$0xff] }
  0xc1   : > { %1435 = vmatpush.bf16.msra.mxu3 %v3115_v2  ;;  %1604 = vmatpush.bf16.msrb.mxu1 %v3130_v6 }
  0xc2   : > { %v697_v28 = vadd.f32 %v693_v18, %v605_v14 }
  0xc5   : > { %1436 = vmatpush.bf16.msra.mxu3 %v3114_v13 }
  0xcf   : > { %v777_v7 = vpop.f32.mrf.mxu0 }
  0xd0   : > { %v782_v11 = vadd.f32 %v777_v7, %v696_v5  ;;  %v867_v12 = vpop.f32.mrf.mxu1 }
  0xd2   : > { %v872_v20 = vadd.f32 %v867_v12, %v782_v11 }
  0xd7   : > { %v953_v24 = vpop.f32.mrf.mxu2  ;;  %v779_v30 = vpop.f32.mrf.mxu0 }
  0xd8   : > { %v958_v29 = vadd.f32 %v953_v24, %v872_v20  ;;  %v783_v34 = vadd.f32 %v779_v30, %v697_v28  ;;  %v869_v32 = vpop.f32.mrf.mxu1 }
  0xda   : > { %v964_v33 = vadd.f32 %v3235_v21, %v958_v29  ;;  %v873_v40 = vadd.f32 %v869_v32, %v783_v34 }
  0xdc   : > { %v966_v35 = vmax.f32 %v964_v33, 0.0 }
  0xde   : > { %v969_v39 = vrot.slane %v966_v35, 1 }
  0xdf   : > { %v955_v41 = vpop.f32.mrf.mxu2 }
  0xe0   : > { %v971_v42 = vmax.f32 %v966_v35, %v969_v39  ;;  %v959_v43 = vadd.f32 %v955_v41, %v873_v40  ;;  %v3161_v39 = vld [vmem:[#allocation6 + $0xb8] sm:$0xff]  ;;  %v3144_v40 = vld [vmem:[#allocation6 + $0x30] sm:$0xff] }
  0xe1   : > { %v3153_v41 = vld [vmem:[#allocation6 + $0x78] sm:$0xff] }
  0xe2   : > { %v965_v48 = vadd.f32 %v3235_v21, %v959_v43  ;;  %v978_v49 = vrot.slane %v971_v42, 1  ;;  %v995_v54 = vsel %vm994_vm9, %v966_v35, %v971_v42  ;;  %v980_v57 = vrot.slane %v971_v42, 2  ;;  %v3160_v42 = vld [vmem:[#allocation6 + $0xb0] sm:$0xff]  ;;  %v3143_v43 = vld [vmem:[#allocation6 + $0x28] sm:$0xff]  ;;  %1746 = vmatpush.bf16.msrb.mxu2 %v3153_v41 }
  0xe4   : > { %v967_v50 = vmax.f32 %v965_v48, 0.0  ;;  %v997_v60 = vsel %vm342_vm0, %v995_v54, %v978_v49  ;;  %v3158_v48 = vld [vmem:[#allocation6 + $0xa0] sm:$0xff]  ;;  %v3141_v49 = vld [vmem:[#allocation6 + $0x18] sm:$0xff]  ;;  %v3140_v54 = vld [vmem:[#allocation6 + $0x10] sm:$0xff] }
  0xe5   : > { %v999_v3 = vsel %vm998_vm10, %v997_v60, %v980_v57  ;;  %v3149_v57 = vld [vmem:[#allocation6 + $0x58] sm:$0xff]  ;;  %v3168_v60 = vld [vmem:[#allocation6 + $0xf0] sm:$0xff] }
  0xe6   : > { %v973_v55 = vrot.slane %v967_v50, 1  ;;  %v992_v1 = vrot.slane %v967_v50, 7  ;;  %1747 = vmatpush.bf16.msrb.mxu2 %v3152_v44  ;;  %v3162_v44 = vld [vmem:[#allocation6 + $0xc0] sm:$0xff] }
  0xe8   : > { %v975_v61 = vmax.f32 %v966_v35, %v973_v55  ;;  %v976_v62 = vmax.f32 %v967_v50, %v973_v55  ;;  %v1009_v10 = vpack.c.bf16 %v992_v1, %v992_v1  ;;  %v3169_v55 = vld [vmem:[#allocation6 + $0xf8] sm:$0xff]  ;;  %v3167_v1 = vld [vmem:[#allocation6 + $0xe8] sm:$0xff] }
  0xea   : > { %v983_v63 = vrot.slane %v975_v61, 3  ;;  %v986_v0 = vrot.slane %v976_v62, 4  ;;  %v988_v4 = vrot.slane %v976_v62, 5  ;;  %v990_v7 = vrot.slane %v976_v62, 6  ;;  %1748 = vmatpush.bf16.msrb.mxu2 %v3151_v47  ;;  %v3148_v61 = vld [vmem:[#allocation6 + $0x50] sm:$0xff]  ;;  %v3155_v62 = vld [vmem:[#allocation6 + $0x88] sm:$0xff] }
  0xeb   : > { %v1013_v15 = vunpack.c.l.b16 %v1009_v10  ;;  %v3184_v10 = vld [vmem:[#allocation6 + $0x170] sm:$0xff] }
  0xec   : > { %v1001_v5 = vsel %vm1000_vm11, %v999_v3, %v983_v63  ;;  %v3185_v3 = vld [vmem:[#allocation6 + $0x178] sm:$0xff] }
  0xed   : > { %v1003_v8 = vsel %vm891_vm8, %v1001_v5, %v986_v0  ;;  %v3138_v0 = vld [vmem:[#allocation6] sm:$0xff] }
  0xee   : > { %v1005_v9 = vsel %vm715_vm6, %v1003_v8, %v988_v4  ;;  %1749 = vmatpush.bf16.msrb.mxu2 %v3150_v51  ;;  %v3147_v4 = vld [vmem:[#allocation6 + $0x48] sm:$0xff]  ;;  %v3154_v5 = vld [vmem:[#allocation6 + $0x80] sm:$0xff] }
  0xef   : > { %v1007_v11 = vsel %vm537_vm4, %v1005_v9, %v990_v7  ;;  %v3166_v8 = vld [vmem:[#allocation6 + $0xe0] sm:$0xff]  ;;  %v3193_v9 = vld [vmem:[#allocation6 + $0x1b8] sm:$0xff] }
  0xf0   : > { %v1008_v12 = vpack.c.bf16 %v1007_v11, %v1007_v11 }
  0xf2   : > { %v1012_v14 = vunpack.c.l.b16 %v1008_v12  ;;  %1750 = vmatpush.bf16.msrb.mxu2 %v3149_v57  ;;  %v3146_v12 = vld [vmem:[#allocation6 + $0x40] sm:$0xff]  ;;  %v3172_v57 = vld [vmem:[#allocation6 + $0x110] sm:$0xff] }
  0xf4   : > { %v1014_v16 = vpack.c.b16 %v1013_v15, %v1012_v14  ;;  %v3165_v14 = vld [vmem:[#allocation6 + $0xd8] sm:$0xff] }
  0xf5   : > { %v3177_v15 = vld [vmem:[#allocation6 + $0x138] sm:$0xff] }
  0xf6   : > { %v1016_v17 = vshrl.u32 %v1014_v16, 16  ;;  %v1019_v18 = vshll.u32 %v1014_v16, 16  ;;  %1751 = vmatpush.bf16.msrb.mxu2 %v3148_v61  ;;  %v3192_v16 = vld [vmem:[#allocation6 + $0x1b0] sm:$0xff]  ;;  %v3178_v61 = vld [vmem:[#allocation6 + $0x140] sm:$0xff] }
  0xf8   : > { %v1018_v19 = vrot.slane %v1016_v17, 6  ;;  %v1021_v20 = vrot.slane %v1019_v18, 7  ;;  %v3183_v17 = vld [vmem:[#allocation6 + $0x168] sm:$0xff] }
  0xfa   : > { %v1022_v21 = vor.u32 %v1021_v20, %v1018_v19  ;;  %1752 = vmatpush.bf16.msrb.mxu2 %v3147_v4  ;;  %v3186_v4 = vld [vmem:[#allocation6 + $0x180] sm:$0xff] }
  0xfc   : > { %v1024_v22 = vsel %vm3436_vm2, 0, %v1022_v21 }
  0xfd   : > { %v1027_v23 = vsel %vm715_vm6, %v1024_v22, 0  ;;  %2636 = vmatmul.msk.bf16.vlgmr.msra.gmra.mxu0 %vm715_vm6, %v1024_v22  ;;  %v3164_v22 = vld [vmem:[#allocation6 + $0xd0] sm:$0xff] }
  0xfe   : > { %v1211_v24 = vrot.slane %v1027_v23, 1  ;;  %v1062_v26 = vshrl.u32 %v1027_v23, 16  ;;  %v1064_v27 = vshll.u32 %v1027_v23, 16  ;;  %v1547_v31 = vrot.slane %v1027_v23, 3  ;;  %1888 = vmatpush.bf16.msra.mxu0 %v3161_v39  ;;  %1753 = vmatpush.bf16.msrb.mxu2 %v3146_v12  ;;  %v3181_v39 = vld [vmem:[#allocation6 + $0x158] sm:$0xff] }
  0xff   : > { %v1379_v32 = vrot.slane %v1027_v23, 2  ;;  %v3176_v23 = vld [vmem:[#allocation6 + $0x130] sm:$0xff] }
 0x100   : > { %1269 = vmatmul.bf16.vlgmr.msra.gmra.mxu1 %v1211_v24  ;;  %v1066_v28 = vrot.slane %v1064_v27, 1  ;;  %v1294_v29 = vrot.slane %v1062_v26, 1  ;;  %v1295_v30 = vrot.slane %v1064_v27, 2  ;;  %v1462_v35 = vrot.slane %v1062_v26, 2 }
 0x101   : > { %v1463_v36 = vrot.slane %v1064_v27, 3  ;;  %1971 = vmatpush.bf16.msra.mxu1 %v3169_v55  ;;  %v3182_v27 = vld [vmem:[#allocation6 + $0x160] sm:$0xff]  ;;  %v3179_v55 = vld [vmem:[#allocation6 + $0x148] sm:$0xff] }
 0x102   : > { %v1067_v33 = vor.u32 %v1066_v28, %v1062_v26  ;;  %v1296_v34 = vor.u32 %v1295_v30, %v1294_v29  ;;  %1889 = vmatpush.bf16.msra.mxu0 %v3160_v42  ;;  %v3191_v26 = vld [vmem:[#allocation6 + $0x1a8] sm:$0xff] }
 0x103   : > { %v1464_v37 = vor.u32 %v1463_v36, %v1462_v35  ;;  %v3163_v36 = vld [vmem:[#allocation6 + $0xc8] sm:$0xff] }
 0x104   : > { %1125 = vmatmul.bf16.vlgmr.msrb.gmra.mxu3 %v1067_v33  ;;  %1354 = vmatmul.bf16.vlgmr.msra.gmra.mxu2 %v1296_v34  ;;  %v3236_v33 = vld [vmem:[%s3523_s4] ss:$0 sm:$0xff] }
 0x105   : > { %1807 = vmatpush.bf16.msrb.mxu3 %v3145_v38  ;;  %1972 = vmatpush.bf16.msra.mxu1 %v3168_v60  ;;  %v3187_v60 = vld [vmem:[#allocation6 + $0x188] sm:$0xff] }
 0x106   : > { %1890 = vmatpush.bf16.msra.mxu0 %v3159_v45  ;;  %2052 = vmatpush.bf16.msra.mxu2 %v3177_v15  ;;  %v3174_v45 = vld [vmem:[#allocation6 + $0x120] sm:$0xff] }
 0x109   : > { %1808 = vmatpush.bf16.msrb.mxu3 %v3144_v40  ;;  %1973 = vmatpush.bf16.msra.mxu1 %v3167_v1  ;;  %v3171_v1 = vld [vmem:[#allocation6 + $0x108] sm:$0xff] }
 0x10a   : > { %1891 = vmatpush.bf16.msra.mxu0 %v3158_v48  ;;  %2053 = vmatpush.bf16.msra.mxu2 %v3176_v23 }
 0x10d   : > { %1522 = vmatmul.bf16.vlgmr.msrb.gmra.mxu0 %v1464_v37  ;;  %1809 = vmatpush.bf16.msrb.mxu3 %v3143_v43  ;;  %v3175_v37 = vld [vmem:[#allocation6 + $0x128] sm:$0xff] }
 0x10e   : > { %1892 = vmatpush.bf16.msra.mxu0 %v3157_v52  ;;  %1974 = vmatpush.bf16.msra.mxu1 %v3166_v8 }
 0x10f   : > { %2054 = vmatpush.bf16.msra.mxu2 %v3175_v37 }
 0x110   : > { %1605 = vmatmul.bf16.vlgmr.msrb.gmra.mxu1 %v1547_v31  ;;  %v3190_v31 = vld [vmem:[#allocation6 + $0x1a0] sm:$0xff] }
 0x111   : > { %1810 = vmatpush.bf16.msrb.mxu3 %v3142_v46  ;;  %v3189_v46 = vld [vmem:[#allocation6 + $0x198] sm:$0xff] }
 0x112   : > { %1893 = vmatpush.bf16.msra.mxu0 %v3156_v58  ;;  %1975 = vmatpush.bf16.msra.mxu1 %v3165_v14 }
 0x113   : > { %2055 = vmatpush.bf16.msra.mxu2 %v3174_v45 }
 0x114   : > { %1437 = vmatmul.bf16.vlgmr.msra.gmra.mxu3 %v1379_v32 }
 0x115   : > { %1811 = vmatpush.bf16.msrb.mxu3 %v3141_v49  ;;  %v3180_v49 = vld [vmem:[#allocation6 + $0x150] sm:$0xff] }
 0x116   : > { %1894 = vmatpush.bf16.msra.mxu0 %v3155_v62  ;;  %1976 = vmatpush.bf16.msra.mxu1 %v3164_v22 }
 0x119   : > { %1812 = vmatpush.bf16.msrb.mxu3 %v3140_v54  ;;  %v3188_v54 = vld [vmem:[#allocation6 + $0x190] sm:$0xff] }
 0x11a   : > { %1895 = vmatpush.bf16.msra.mxu0 %v3154_v5  ;;  %1977 = vmatpush.bf16.msra.mxu1 %v3163_v36 }
 0x11d   : > { %1813 = vmatpush.bf16.msrb.mxu3 %v3139_v59 }
 0x11e   : > { %2216 = vmatpush.bf16.msrb.mxu0 %v3193_v9  ;;  %1978 = vmatpush.bf16.msra.mxu1 %v3162_v44  ;;  %v3170_v9 = vld [vmem:[#allocation6 + $0x100] sm:$0xff] }
 0x121   : > { %1814 = vmatpush.bf16.msrb.mxu3 %v3138_v0 }
 0x122   : > { %2217 = vmatpush.bf16.msrb.mxu0 %v3192_v16 }
 0x125   : > { %2135 = vmatpush.bf16.msra.mxu3 %v3185_v3 }
 0x126   : > { %2218 = vmatpush.bf16.msrb.mxu0 %v3191_v26 }
 0x129   : > { %2136 = vmatpush.bf16.msra.mxu3 %v3184_v10 }
 0x12a   : > { %2219 = vmatpush.bf16.msrb.mxu0 %v3190_v31 }
 0x12d   : > { %2137 = vmatpush.bf16.msra.mxu3 %v3183_v17 }
 0x12e   : > { %2220 = vmatpush.bf16.msrb.mxu0 %v3189_v46 }
 0x131   : > { %2138 = vmatpush.bf16.msra.mxu3 %v3182_v27 }
 0x132   : > { %2221 = vmatpush.bf16.msrb.mxu0 %v3188_v54 }
 0x135   : > { %2139 = vmatpush.bf16.msra.mxu3 %v3181_v39 }
 0x136   : > { %2222 = vmatpush.bf16.msrb.mxu0 %v3187_v60 }
 0x139   : > { %2140 = vmatpush.bf16.msra.mxu3 %v3180_v49 }
 0x13a   : > { %2223 = vmatpush.bf16.msrb.mxu0 %v3186_v4 }
 0x13d   : > { %2141 = vmatpush.bf16.msra.mxu3 %v3179_v55 }
 0x141   : > { %2142 = vmatpush.bf16.msra.mxu3 %v3178_v61 }
 0x17a   : > { %v1188_v50 = vpop.f32.mrf.mxu0 }
 0x17d   : > { %v1270_v53 = vpop.f32.mrf.mxu1 }
 0x182   : > { %v1190_v63 = vpop.f32.mrf.mxu0 }
 0x185   : > { %v1272_v6 = vpop.f32.mrf.mxu1 }
 0x187   : > { %v1126_v56 = vpop.f32.mrf.mxu3  ;;  %v1355_v13 = vpop.f32.mrf.mxu2 }
 0x188   : > { %v1189_v2 = vadd.f32 %v1188_v50, %v1126_v56 }
 0x18a   : > { %v1275_v11 = vadd.f32 %v1270_v53, %v1189_v2  ;;  %v1523_v20 = vpop.f32.mrf.mxu0  ;;  %v3173_v53 = vld [vmem:[#allocation6 + $0x118] sm:$0xff] }
 0x18b   : > { %2056 = vmatpush.bf16.msra.mxu2 %v3173_v53 }
 0x18c   : > { %v1360_v18 = vadd.f32 %v1355_v13, %v1275_v11 }
 0x18d   : > { %v1606_v28 = vpop.f32.mrf.mxu1 }
 0x18f   : > { %v1128_v7 = vpop.f32.mrf.mxu3  ;;  %v1357_v35 = vpop.f32.mrf.mxu2  ;;  %2057 = vmatpush.bf16.msra.mxu2 %v3172_v57 }
 0x190   : > { %v1191_v19 = vadd.f32 %v1190_v63, %v1128_v7 }
 0x192   : > { %v1276_v29 = vadd.f32 %v1272_v6, %v1191_v19  ;;  %v1525_v43 = vpop.f32.mrf.mxu0 }
 0x193   : > { %2058 = vmatpush.bf16.msra.mxu2 %v3171_v1 }
 0x194   : > { %v1361_v32 = vadd.f32 %v1357_v35, %v1276_v29 }
 0x195   : > { %v1608_v50 = vpop.f32.mrf.mxu1 }
 0x197   : > { %v1438_v21 = vpop.f32.mrf.mxu3  ;;  %2059 = vmatpush.bf16.msra.mxu2 %v3170_v9 }
 0x198   : > { %v1443_v24 = vadd.f32 %v1438_v21, %v1360_v18 }
 0x19a   : > { %v1528_v30 = vadd.f32 %v1523_v20, %v1443_v24 }
 0x19c   : > { %v1611_v34 = vadd.f32 %v1606_v28, %v1528_v30 }
 0x19e   : > { %v1617_v38 = vadd.f32 %v3236_v33, %v1611_v34 }
 0x19f   : > { %v1440_v40 = vpop.f32.mrf.mxu3 }
 0x1a0   : > { %v1619_v41 = vmax.f32 %v1617_v38, 0.0  ;;  %v1444_v42 = vadd.f32 %v1440_v40, %v1361_v32 }
 0x1a2   : > { %v1622_v47 = vrot.slane %v1619_v41, 1  ;;  %v1529_v48 = vadd.f32 %v1525_v43, %v1444_v42 }
 0x1a4   : > { %v1624_v51 = vmax.f32 %v1619_v41, %v1622_v47  ;;  %v1612_v52 = vadd.f32 %v1608_v50, %v1529_v48  ;;  %v3237_v50 = vld [vmem:[%s3525_s6] ss:$0 sm:$0xff] }
 0x1a6   : > { %v1618_v56 = vadd.f32 %v3236_v33, %v1612_v52  ;;  %v1630_v58 = vrot.slane %v1624_v51, 1  ;;  %v1637_v62 = vsel %vm994_vm9, %v1619_v41, %v1624_v51  ;;  %v1632_v0 = vrot.slane %v1624_v51, 2 }
 0x1a8   : > { %v1620_v59 = vmax.f32 %v1618_v56, 0.0  ;;  %v1638_v2 = vsel %vm342_vm0, %v1637_v62, %v1630_v58 }
 0x1a9   : > { %v1639_v6 = vsel %vm998_vm10, %v1638_v2, %v1632_v0 }
 0x1aa   : > { %v1626_v63 = vrot.slane %v1620_v59, 1 }
 0x1ac   : > { %v1628_v3 = vmax.f32 %v1619_v41, %v1626_v63 }
 0x1ae   : > { %v1635_v5 = vrot.slane %v1628_v3, 3 }
 0x1b0   : > { %v1640_v7 = vsel %vm1000_vm11, %v1639_v6, %v1635_v5 }
 0x1b1   : > { %v1641_v8 = vpack.c.bf16 %v1640_v7, %v1640_v7 }
 0x1b3   : > { %v1643_v10 = vunpack.c.l.b16 %v1641_v8 }
 0x1b5   : > { %v1644_v11 = vpack.c.b16 %v1643_v10, %v1643_v10 }
 0x1b7   : > { %v1646_v12 = vshrl.u32 %v1644_v11, 16  ;;  %v1649_v13 = vshll.u32 %v1644_v11, 16 }
 0x1b9   : > { %v1648_v14 = vrot.slane %v1646_v12, 6  ;;  %v1651_v15 = vrot.slane %v1649_v13, 7 }
 0x1bb   : > { %v1652_v16 = vor.u32 %v1651_v15, %v1648_v14 }
 0x1bd   : > { %v1654_v17 = vsel %vm3436_vm2, 0, %v1652_v16 }
 0x1be   : > { %v1656_v18 = vsel %vm1000_vm11, %v1654_v17, 0  ;;  %2861 = vmatmul.msk.bf16.vlgmr.msrb.gmra.mxu3 %vm1000_vm11, %v1654_v17 }
 0x1bf   : > { %v1693_v19 = vshll.u32 %v1656_v18, 16  ;;  %v1838_v20 = vrot.slane %v1656_v18, 1  ;;  %v1691_v21 = vshrl.u32 %v1656_v18, 16  ;;  %v2166_v25 = vrot.slane %v1656_v18, 3 }
 0x1c0   : > { %v2002_v33 = vrot.slane %v1656_v18, 2 }
 0x1c1   : > { %1896 = vmatmul.bf16.vlgmr.msra.gmra.mxu0 %v1838_v20  ;;  %v1695_v22 = vrot.slane %v1693_v19, 1  ;;  %v1919_v23 = vrot.slane %v1691_v21, 1  ;;  %v1920_v24 = vrot.slane %v1693_v19, 2  ;;  %v2083_v28 = vrot.slane %v1691_v21, 2 }
 0x1c2   : > { %v2084_v29 = vrot.slane %v1693_v19, 3 }
 0x1c3   : > { %v1696_v26 = vor.u32 %v1695_v22, %v1691_v21  ;;  %v1921_v27 = vor.u32 %v1920_v24, %v1919_v23 }
 0x1c4   : > { %v2085_v30 = vor.u32 %v2084_v29, %v2083_v28 }
 0x1c5   : > { %1754 = vmatmul.bf16.vlgmr.msrb.gmra.mxu2 %v1696_v26  ;;  %1979 = vmatmul.bf16.vlgmr.msra.gmra.mxu1 %v1921_v27 }
 0x1ce   : > { %2143 = vmatmul.bf16.vlgmr.msra.gmra.mxu3 %v2085_v30 }
 0x1d1   : > { %2224 = vmatmul.bf16.vlgmr.msrb.gmra.mxu0 %v2166_v25 }
 0x1d5   : > { %2060 = vmatmul.bf16.vlgmr.msra.gmra.mxu2 %v2002_v33 }
 0x23e   : > { %v1897_v34 = vpop.f32.mrf.mxu0 }
 0x241   : > { %v1816_v35 = vpop.f32.mrf.mxu3 }
 0x242   : > { %v1980_v36 = vpop.f32.mrf.mxu1 }
 0x246   : > { %v1899_v37 = vpop.f32.mrf.mxu0 }
 0x248   : > { %v1755_v31 = vpop.f32.mrf.mxu2 }
 0x249   : > { %v1818_v32 = vpop.f32.mrf.mxu3  ;;  %v1817_v40 = vadd.f32 %v1816_v35, %v1755_v31 }
 0x24a   : > { %v1982_v38 = vpop.f32.mrf.mxu1 }
 0x24b   : > { %v1901_v43 = vadd.f32 %v1897_v34, %v1817_v40 }
 0x24d   : > { %v1984_v45 = vadd.f32 %v1980_v36, %v1901_v43 }
 0x24e   : > { %v2225_v39 = vpop.f32.mrf.mxu0 }
 0x250   : > { %v1757_v41 = vpop.f32.mrf.mxu2 }
 0x251   : > { %v2144_v42 = vpop.f32.mrf.mxu3 }
 0x256   : > { %v2227_v44 = vpop.f32.mrf.mxu0 }
 0x258   : > { %v2061_v46 = vpop.f32.mrf.mxu2 }
 0x259   : > { %v2065_v47 = vadd.f32 %v2061_v46, %v1984_v45  ;;  %v2146_v48 = vpop.f32.mrf.mxu3 }
 0x25b   : > { %v2148_v49 = vadd.f32 %v2144_v42, %v2065_v47 }
 0x25d   : > { %v2229_v51 = vadd.f32 %v2225_v39, %v2148_v49 }
 0x25f   : > { %v2234_v52 = vadd.f32 %v3237_v50, %v2229_v51 }
 0x260   : > { %v2063_v53 = vpop.f32.mrf.mxu2 }
 0x261   : > { %v2235_v54 = vmax.f32 %v2234_v52, 0.0 }
 0x263   : > { %v2237_v55 = vrot.slane %v2235_v54, 1 }
 0x265   : > { %v2239_v56 = vmax.f32 %v2235_v54, %v2237_v55 }
 0x267   : > { %v2241_v57 = vrot.slane %v2239_v56, 1  ;;  %v2243_v58 = vsel %vm994_vm9, %v2235_v54, %v2239_v56 }
 0x269   : > { %v2244_v59 = vsel %vm342_vm0, %v2243_v58, %v2241_v57 }
 0x26a   : > { %v2245_v60 = vsel %vm998_vm10, %v2244_v59, 0.0 }
 0x26b   : > { %v2246_v61 = vrot.slane %v2245_v60, 4 }
 0x26d   : > { %v2247_v62 = vadd.f32 %v2246_v61, %v2245_v60 }
 0x26f   : > { %v2248_v63 = vrot.slane %v2247_v62, 2 }
 0x271   : > { %v2249_v0 = vadd.f32 %v2248_v63, %v2247_v62 }
 0x273   : > { %v2250_v1 = vrot.slane %v2249_v0, 1 }
 0x275   : > { %v2251_v2 = vadd.f32 %v2250_v1, %v2249_v0 }
 0x277   : > { %2252 = vst [vmem:[%s324_s12] sm:$0x1] %v2251_v2 }
 0x278 PF: > { %s19_s24 = sadd.s32 1, %s3342_s24  }
 0x279   : > { %p16_p7 = scmp.ge.s32.totalorder %s19_s24, 6  }
 0x27b   :  { %18 = sbr.rel (!%p16_p7) target bundleno = 2 (0x2), region = 109 }
 0x280   :  { %2270 = vsyncpa [#allocation3], 1 }
 0x281   :  { %2272 = vsyncpa [#allocation3 + $0x1], 1 }
 0x282   :  { %2273 = vsyncpa [#allocation5], 1 }

</bundles_post_ra>
